<compile_context>
chip_gen: v7x
topology: tpu7x:2x2x1
jax: 0.10.0
libtpu: 0.0.40
codegen_flags: <defaults>
</compile_context>

<pallas_src>
import functools

import jax
import jax.numpy as jnp
from jax import lax
from jax.experimental import pallas as pl
from jax.experimental.pallas import tpu as pltpu

BN_EPS = 1e-5
LEAKY_SLOPE = 0.01


def _ceil_to(x, m):
    return (x + m - 1) // m * m


def _vmem_limit_bytes(per_step_bytes):
    # Generation-aware cap: ~60% of physical VMEM (v7x: 64 MiB/TC, v5e/v6e: 128 MiB).
    try:
        cap = int(pltpu.get_tpu_info().vmem_capacity_bytes)
    except Exception:  # pragma: no cover - conservative fallback
        cap = 64 << 20
    want = 2 * per_step_bytes + (4 << 20)       # double buffering + headroom
    return int(min(max(want, 8 << 20), (cap * 3) // 5))


def _conv_stats_kernel(mask_ref, xl_ref, xc_ref, xr_ref, w_ref,
                       y_ref, stats_ref, xcat_s, patch_s, *, hpwp, wp):
    """In-VMEM im2col (27 shifted windows) -> one MXU dot -> masked BN partials."""
    cin, tm = xc_ref.shape
    # [left | center | right] tiles: every tap is a static window of one buffer.
    xcat_s[:, 0:tm] = xl_ref[...].astype(jnp.float32)
    xcat_s[:, tm:2 * tm] = xc_ref[...].astype(jnp.float32)
    xcat_s[:, 2 * tm:3 * tm] = xr_ref[...].astype(jnp.float32)
    t = 0
    for kd in (-1, 0, 1):
        for kh in (-1, 0, 1):
            for kw in (-1, 0, 1):
                off = kd * hpwp + kh * wp + kw          # constant flat tap offset
                patch_s[t * cin:(t + 1) * cin, :] = xcat_s[:, tm + off:2 * tm + off]
                t += 1
    # Single MXU pass, contraction depth 27*Cin, f32 accumulation.
    y = jnp.dot(w_ref[...], patch_s[...], preferred_element_type=jnp.float32)
    # Zero halo/garbage columns of the padded grid -> stats and y stay clean.
    y = y * mask_ref[...].astype(jnp.float32)
    y_ref[...] = y.astype(y_ref.dtype)                  # bf16 to HBM
    # One-pass BN partials, single store.
    # TODO(synk): E[x^2]-E[x]^2 in f32 can cancel if |mean| >> std; switch to a
    # per-tile-centered (Chan/Welford) combine if that regime appears.
    stats_ref[...] = jnp.concatenate(
        [jnp.sum(y, axis=1, keepdims=True),
         jnp.sum(y * y, axis=1, keepdims=True)], axis=1)


def _bn_act_deconv_kernel(y_ref, const_ref, o_ref):
    """Folded BN affine -> LeakyReLU -> ConvTranspose3d(k=2, s=2) as per-tap FMA."""
    c4 = y_ref.shape[0]
    # Packed constants: [:, :C4]=wt(C8,C4), [:, C4]=bias(C8), [:C4, C4+1]=scale,
    # [:C4, C4+2]=shift.  One DMA instead of four.
    wt = const_ref[:, 0:c4]
    bias = const_ref[:, c4:c4 + 1]
    scale = const_ref[0:c4, c4 + 1:c4 + 2]
    shift = const_ref[0:c4, c4 + 2:c4 + 3]
    z = y_ref[...].astype(jnp.float32) * scale + shift   # f32 VPU
    z = jnp.where(z > 0.0, z, jnp.float32(LEAKY_SLOPE) * z)
    if c4 <= 32:
        # Shallow contraction: VPU broadcast-FMAs; MXU would run at ~C4/256 eff.
        out = wt[:, 0:1] * z[0:1, :]
        for c in range(1, c4):
            out = out + wt[:, c:c + 1] * z[c:c + 1, :]
        out = out + bias
    else:
        out = jnp.dot(wt.astype(jnp.bfloat16), z.astype(jnp.bfloat16),
                      preferred_element_type=jnp.float32) + bias
    o_ref[...] = out.astype(o_ref.dtype)                 # bf16, lane-dense


def upsample_layer(x, shortcut, params, *, tile_m=1024):
    """x, shortcut: NCDHW float32. Returns NCDHW float32 with doubled D, H, W."""
    xc = jnp.concatenate([x, shortcut], axis=1)           # (N, Cin, D, H, W)
    N, Cin, D, H, W = xc.shape
    conv_w = params["conv_w"]                              # (C4, Cin, 3, 3, 3)
    C4 = conv_w.shape[0]
    C8 = 8 * C4
    Dp, Hp, Wp = D + 2, H + 2, W + 2
    hpwp = Hp * Wp
    Mq = N * Dp * hpwp                                     # padded-grid positions
    M = N * D * H * W                                      # valid positions
    Cin_p = _ceil_to(Cin, 8)
    Kp = 27 * Cin_p
    halo = hpwp + Wp + 1                                   # max |flat tap offset|

    # Lane-axis tile: multiple of 128, >= halo; keep >= 2 tiles for v7x's 2 TCs.
    TM = _ceil_to(max(128, min(int(tile_m), Mq)), 128)
    TM = max(TM, _ceil_to(halo, 128))
    if pl.cdiv(Mq, TM) < 2:
        tm2 = _ceil_to(pl.cdiv(Mq, 2), 128)
        if tm2 >= halo:
            TM = tm2
    G = pl.cdiv(Mq, TM)
    Mq_pad = G * TM

    # ---- glue: channels-first, flat zero-padded volume (Cin_p, Mq_pad), bf16 ----
    xpad = jnp.pad(xc.astype(jnp.bfloat16),
                   ((0, 0), (0, Cin_p - Cin), (1, 1), (1, 1), (1, 1)))
    x_flat = jnp.transpose(xpad, (1, 0, 2, 3, 4)).reshape(Cin_p, Mq)
    x_flat = jnp.pad(x_flat, ((0, 0), (0, Mq_pad - Mq)))

    # Validity mask over the padded grid (1 inside the original D/H/W box).
    mask = jnp.pad(jnp.ones((N, D, H, W), jnp.bfloat16),
                   ((0, 0), (1, 1), (1, 1), (1, 1))).reshape(1, Mq)
    mask = jnp.pad(mask, ((0, 0), (0, Mq_pad - Mq)))

    # Conv weight -> (C4, 27*Cin_p), K ordered (kd, kh, kw, cin); f32 (stays in VMEM).
    wT = jnp.transpose(conv_w, (0, 2, 3, 4, 1)).reshape(C4, 27, Cin)
    wT = jnp.pad(wT, ((0, 0), (0, 0), (0, Cin_p - Cin))).reshape(C4, Kp)
    wT = wT.astype(jnp.float32)

    # ---- kernel 1: in-VMEM im2col + conv matmul + masked BN partials ----------
    k1 = functools.partial(_conv_stats_kernel, hpwp=hpwp, wp=Wp)
    bytes1 = (TM * 2 + 3 * Cin_p * TM * 2 + C4 * Kp * 4 + C4 * TM * 2
              + C4 * 2 * 4 + Cin_p * 3 * TM * 4 + Kp * TM * 4)
    yT, stats = pl.pallas_call(
        k1,
        out_shape=(jax.ShapeDtypeStruct((C4, Mq_pad), jnp.bfloat16),
                   jax.ShapeDtypeStruct((G, C4, 2), jnp.float32)),
        grid=(G,),
        in_specs=[
            pl.BlockSpec((1, TM), lambda i: (0, i)),
            pl.BlockSpec((Cin_p, TM), lambda i: (0, jnp.maximum(i - 1, 0))),
            pl.BlockSpec((Cin_p, TM), lambda i: (0, i)),
            pl.BlockSpec((Cin_p, TM), lambda i: (0, jnp.minimum(i + 1, G - 1))),
            pl.BlockSpec((C4, Kp), lambda i: (0, 0)),
        ],
        out_specs=(
            pl.BlockSpec((C4, TM), lambda i: (0, i)),
            pl.BlockSpec((None, C4, 2), lambda i: (i, 0, 0)),
        ),
        scratch_shapes=[pltpu.VMEM((Cin_p, 3 * TM), jnp.float32),
                        pltpu.VMEM((Kp, TM), jnp.float32)],
        compiler_params=pltpu.CompilerParams(
            dimension_semantics=("parallel",),
            vmem_limit_bytes=_vmem_limit_bytes(bytes1)),
        # TODO(synk): sweep pipeline_mode=pl.Buffered(3) on the x/y streams (v7x).
    )(mask, x_flat, x_flat, x_flat, wT)

    # ---- fold BN (training-mode batch stats, biased variance) to scale/shift --
    cnt = jnp.float32(M)
    mean = jnp.sum(stats[:, :, 0], axis=0) / cnt
    var = jnp.maximum(jnp.sum(stats[:, :, 1], axis=0) / cnt - mean * mean, 0.0)
    scale = params["gamma"].astype(jnp.float32) * lax.rsqrt(var + BN_EPS)
    shift = params["beta"].astype(jnp.float32) - mean * scale

    # ConvTranspose3d weight (C4_in, C4_out, 2, 2, 2) -> (8*C4, C4), rows (kd,kh,kw,cout).
    wtT = jnp.transpose(params["wt"], (2, 3, 4, 1, 0)).reshape(C8, C4).astype(jnp.float32)
    biasT = jnp.tile(params["bt"].astype(jnp.float32), 8).reshape(C8, 1)
    col_scale = jnp.zeros((C8,), jnp.float32).at[:C4].set(scale).reshape(C8, 1)
    col_shift = jnp.zeros((C8,), jnp.float32).at[:C4].set(shift).reshape(C8, 1)
    const = jnp.concatenate([wtT, biasT, col_scale, col_shift], axis=1)   # (C8, C4+3)

    # ---- kernel 2: BN affine + LeakyReLU + deconv taps (parallel over M) -------
    bytes2 = C4 * TM * 2 + C8 * (C4 + 3) * 4 + C8 * TM * 2
    oT = pl.pallas_call(
        _bn_act_deconv_kernel,
        out_shape=jax.ShapeDtypeStruct((C8, Mq_pad), jnp.bfloat16),
        grid=(G,),
        in_specs=[
            pl.BlockSpec((C4, TM), lambda i: (0, i)),
            pl.BlockSpec((C8, C4 + 3), lambda i: (0, 0)),
        ],
        out_specs=pl.BlockSpec((C8, TM), lambda i: (0, i)),
        compiler_params=pltpu.CompilerParams(
            dimension_semantics=("parallel",),
            vmem_limit_bytes=_vmem_limit_bytes(bytes2)),
    )(yT, const)

    # ---- glue: drop padded-grid halo, scatter (kd,kh,kw,cout) rows to NCDHW 2x --
    o = oT[:, :Mq].reshape(2, 2, 2, C4, N, Dp, Hp, Wp)
    o = o[:, :, :, :, :, 1:D + 1, 1:H + 1, 1:W + 1]
    o = jnp.transpose(o, (4, 3, 5, 0, 6, 1, 7, 2)).astype(jnp.float32)
    return o.reshape(N, C4, 2 * D, 2 * H, 2 * W)


def reference(x, shortcut, params):
    """Pure-JAX f32 reference of the PyTorch forward (training-mode BatchNorm)."""
    xc = jnp.concatenate([x, shortcut], axis=1)
    y = lax.conv_general_dilated(
        xc, params["conv_w"], (1, 1, 1), [(1, 1)] * 3,
        dimension_numbers=("NCDHW", "OIDHW", "NCDHW"),
    )
    mean = y.mean(axis=(0, 2, 3, 4), keepdims=True)
    var = ((y - mean) ** 2).mean(axis=(0, 2, 3, 4), keepdims=True)
    y = (y - mean) / jnp.sqrt(var + BN_EPS)
    y = y * params["gamma"].reshape(1, -1, 1, 1, 1) + params["beta"].reshape(1, -1, 1, 1, 1)
    y = jnp.where(y > 0, y, LEAKY_SLOPE * y)
    # ConvTranspose3d k=2, s=2: out[n,o,2d+i,2h+j,2w+k] = sum_c y[n,c,d,h,w]*wt[c,o,i,j,k] + b[o]
    t = jnp.einsum("ncdhw,coxyz->nodxhywz", y, params["wt"])
    N, Co, D, _, H, _, W, _ = t.shape
    t = t.reshape(N, Co, 2 * D, 2 * H, 2 * W) + params["bt"].reshape(1, -1, 1, 1, 1)
    return t


if __name__ == "__main__":
    # UpsampleLayer(in_channels=8): x has 4 channels, shortcut has 4 channels.
    N, Cx, Cs, D, H, W = 2, 4, 4, 8, 8, 8
    Cin = Cx + Cs          # 8
    C4 = Cin // 4          # 2

    key = jax.random.PRNGKey(0)
    kx, ks, kw, kg, kb, kwt, kbt = jax.random.split(key, 7)

    x = jax.random.normal(kx, (N, Cx, D, H, W), dtype=jnp.float32)
    shortcut = jax.random.normal(ks, (N, Cs, D, H, W), dtype=jnp.float32)

    params = {
        # Conv3d(in=8, out=2, k=3, p=1, bias=False): weight (Cout, Cin, 3, 3, 3)
        "conv_w": 0.1 * jax.random.normal(kw, (C4, Cin, 3, 3, 3), dtype=jnp.float32),
        # BatchNorm3d(2)
        "gamma": 1.0 + 0.1 * jax.random.normal(kg, (C4,), dtype=jnp.float32),
        "beta": 0.1 * jax.random.normal(kb, (C4,), dtype=jnp.float32),
        # ConvTranspose3d(2, 2, k=2, s=2): weight (Cin, Cout, 2, 2, 2), bias (Cout,)
        "wt": 0.1 * jax.random.normal(kwt, (C4, C4, 2, 2, 2), dtype=jnp.float32),
        "bt": 0.1 * jax.random.normal(kbt, (C4,), dtype=jnp.float32),
    }

    fwd = jax.jit(functools.partial(upsample_layer, tile_m=1024))
    out = jax.block_until_ready(fwd(x, shortcut, params))
    ref = jax.block_until_ready(jax.jit(reference)(x, shortcut, params))

    assert out.shape == (N, C4, 2 * D, 2 * H, 2 * W), out.shape
    max_err = float(jnp.max(jnp.abs(out - ref)))
    # bf16 HBM intermediates (f32 accumulation / f32 BN math) -> ~1e-2 parity.
    assert jnp.allclose(out, ref, rtol=2e-2, atol=2e-2), max_err
    print("KERNEL_OK")
</pallas_src>

<mosaic_0001>
module attributes {stable_mosaic.version = 11 : i64} {
  func.func @_conv_stats_kernel(%arg0: i32, %arg1: memref<1x1024xbf16, #tpu.memory_space<vmem>>, %arg2: memref<8x1024xbf16, #tpu.memory_space<vmem>>, %arg3: memref<8x1024xbf16, #tpu.memory_space<vmem>>, %arg4: memref<8x1024xbf16, #tpu.memory_space<vmem>>, %arg5: memref<2x216xf32, #tpu.memory_space<vmem>>, %arg6: memref<2x1024xbf16, #tpu.memory_space<vmem>>, %arg7: memref<1x2x2xf32, #tpu.memory_space<vmem>>, %arg8: memref<8x3072xf32, #tpu.memory_space<vmem>>, %arg9: memref<216x1024xf32, #tpu.memory_space<vmem>>) attributes {dimension_semantics = [#tpu.dimension_semantics<parallel>], iteration_bounds = array<i64: 2>, scalar_prefetch = 0 : i64, scratch_operands = 2 : i64, tpu.core_type = #tpu.core_type<tc>, window_params = [{transform_indices = @transform_0, window_bounds = array<i64: 1, 1024>}, {transform_indices = @transform_1, window_bounds = array<i64: 8, 1024>}, {transform_indices = @transform_2, window_bounds = array<i64: 8, 1024>}, {transform_indices = @transform_3, window_bounds = array<i64: 8, 1024>}, {pipeline_mode = #tpu.pipeline_mode<synchronous>, transform_indices = @transform_4, window_bounds = array<i64: 2, 216>}, {transform_indices = @transform_5, window_bounds = array<i64: 2, 1024>}, {transform_indices = @transform_6, window_bounds = array<i64: 1, 2, 2>}]} {
    %c0 = arith.constant 0 : index
    %c0_0 = arith.constant 0 : index
    %0 = vector.load %arg2[%c0, %c0_0] : memref<8x1024xbf16, #tpu.memory_space<vmem>>, vector<8x1024xbf16>
    %1 = arith.extf %0 : vector<8x1024xbf16> to vector<8x1024xf32>
    %c0_1 = arith.constant 0 : index
    %c0_2 = arith.constant 0 : index
    %2 = vector.load %arg8[%c0_1, %c0_2] : memref<8x3072xf32, #tpu.memory_space<vmem>>, vector<8x1024xf32>
    tpu.vector_store %arg8[%c0_1, %c0_2], %1 {strides = array<i32>} : memref<8x3072xf32, #tpu.memory_space<vmem>>, vector<8x1024xf32>,
    %c0_3 = arith.constant 0 : index
    %c0_4 = arith.constant 0 : index
    %3 = vector.load %arg3[%c0_3, %c0_4] : memref<8x1024xbf16, #tpu.memory_space<vmem>>, vector<8x1024xbf16>
    %4 = arith.extf %3 : vector<8x1024xbf16> to vector<8x1024xf32>
    %c0_5 = arith.constant 0 : index
    %c1024 = arith.constant 1024 : index
    %5 = vector.load %arg8[%c0_5, %c1024] : memref<8x3072xf32, #tpu.memory_space<vmem>>, vector<8x1024xf32>
    tpu.vector_store %arg8[%c0_5, %c1024], %4 {strides = array<i32>} : memref<8x3072xf32, #tpu.memory_space<vmem>>, vector<8x1024xf32>,
    %c0_6 = arith.constant 0 : index
    %c0_7 = arith.constant 0 : index
    %6 = vector.load %arg4[%c0_6, %c0_7] : memref<8x1024xbf16, #tpu.memory_space<vmem>>, vector<8x1024xbf16>
    %7 = arith.extf %6 : vector<8x1024xbf16> to vector<8x1024xf32>
    %c0_8 = arith.constant 0 : index
    %c2048 = arith.constant 2048 : index
    %8 = vector.load %arg8[%c0_8, %c2048] : memref<8x3072xf32, #tpu.memory_space<vmem>>, vector<8x1024xf32>
    tpu.vector_store %arg8[%c0_8, %c2048], %7 {strides = array<i32>} : memref<8x3072xf32, #tpu.memory_space<vmem>>, vector<8x1024xf32>,
    %c0_9 = arith.constant 0 : index
    %c913 = arith.constant 913 : index
    %9 = vector.load %arg8[%c0_9, %c913] : memref<8x3072xf32, #tpu.memory_space<vmem>>, vector<8x1024xf32>
    %c0_10 = arith.constant 0 : index
    %c0_11 = arith.constant 0 : index
    %10 = vector.load %arg9[%c0_10, %c0_11] : memref<216x1024xf32, #tpu.memory_space<vmem>>, vector<8x1024xf32>
    tpu.vector_store %arg9[%c0_10, %c0_11], %9 {strides = array<i32>} : memref<216x1024xf32, #tpu.memory_space<vmem>>, vector<8x1024xf32>,
    %c0_12 = arith.constant 0 : index
    %c914 = arith.constant 914 : index
    %11 = vector.load %arg8[%c0_12, %c914] : memref<8x3072xf32, #tpu.memory_space<vmem>>, vector<8x1024xf32>
    %c8 = arith.constant 8 : index
    %c0_13 = arith.constant 0 : index
    %12 = vector.load %arg9[%c8, %c0_13] : memref<216x1024xf32, #tpu.memory_space<vmem>>, vector<8x1024xf32>
    tpu.vector_store %arg9[%c8, %c0_13], %11 {strides = array<i32>} : memref<216x1024xf32, #tpu.memory_space<vmem>>, vector<8x1024xf32>,
    %c0_14 = arith.constant 0 : index
    %c915 = arith.constant 915 : index
    %13 = vector.load %arg8[%c0_14, %c915] : memref<8x3072xf32, #tpu.memory_space<vmem>>, vector<8x1024xf32>
    %c16 = arith.constant 16 : index
    %c0_15 = arith.constant 0 : index
    %14 = vector.load %arg9[%c16, %c0_15] : memref<216x1024xf32, #tpu.memory_space<vmem>>, vector<8x1024xf32>
    tpu.vector_store %arg9[%c16, %c0_15], %13 {strides = array<i32>} : memref<216x1024xf32, #tpu.memory_space<vmem>>, vector<8x1024xf32>,
    %c0_16 = arith.constant 0 : index
    %c923 = arith.constant 923 : index
    %15 = vector.load %arg8[%c0_16, %c923] : memref<8x3072xf32, #tpu.memory_space<vmem>>, vector<8x1024xf32>
    %c24 = arith.constant 24 : index
    %c0_17 = arith.constant 0 : index
    %16 = vector.load %arg9[%c24, %c0_17] : memref<216x1024xf32, #tpu.memory_space<vmem>>, vector<8x1024xf32>
    tpu.vector_store %arg9[%c24, %c0_17], %15 {strides = array<i32>} : memref<216x1024xf32, #tpu.memory_space<vmem>>, vector<8x1024xf32>,
    %c0_18 = arith.constant 0 : index
    %c924 = arith.constant 924 : index
    %17 = vector.load %arg8[%c0_18, %c924] : memref<8x3072xf32, #tpu.memory_space<vmem>>, vector<8x1024xf32>
    %c32 = arith.constant 32 : index
    %c0_19 = arith.constant 0 : index
    %18 = vector.load %arg9[%c32, %c0_19] : memref<216x1024xf32, #tpu.memory_space<vmem>>, vector<8x1024xf32>
    tpu.vector_store %arg9[%c32, %c0_19], %17 {strides = array<i32>} : memref<216x1024xf32, #tpu.memory_space<vmem>>, vector<8x1024xf32>,
    %c0_20 = arith.constant 0 : index
    %c925 = arith.constant 925 : index
    %19 = vector.load %arg8[%c0_20, %c925] : memref<8x3072xf32, #tpu.memory_space<vmem>>, vector<8x1024xf32>
    %c40 = arith.constant 40 : index
    %c0_21 = arith.constant 0 : index
    %20 = vector.load %arg9[%c40, %c0_21] : memref<216x1024xf32, #tpu.memory_space<vmem>>, vector<8x1024xf32>
    tpu.vector_store %arg9[%c40, %c0_21], %19 {strides = array<i32>} : memref<216x1024xf32, #tpu.memory_space<vmem>>, vector<8x1024xf32>,
    %c0_22 = arith.constant 0 : index
    %c933 = arith.constant 933 : index
    %21 = vector.load %arg8[%c0_22, %c933] : memref<8x3072xf32, #tpu.memory_space<vmem>>, vector<8x1024xf32>
    %c48 = arith.constant 48 : index
    %c0_23 = arith.constant 0 : index
    %22 = vector.load %arg9[%c48, %c0_23] : memref<216x1024xf32, #tpu.memory_space<vmem>>, vector<8x1024xf32>
    tpu.vector_store %arg9[%c48, %c0_23], %21 {strides = array<i32>} : memref<216x1024xf32, #tpu.memory_space<vmem>>, vector<8x1024xf32>,
    %c0_24 = arith.constant 0 : index
    %c934 = arith.constant 934 : index
    %23 = vector.load %arg8[%c0_24, %c934] : memref<8x3072xf32, #tpu.memory_space<vmem>>, vector<8x1024xf32>
    %c56 = arith.constant 56 : index
    %c0_25 = arith.constant 0 : index
    %24 = vector.load %arg9[%c56, %c0_25] : memref<216x1024xf32, #tpu.memory_space<vmem>>, vector<8x1024xf32>
    tpu.vector_store %arg9[%c56, %c0_25], %23 {strides = array<i32>} : memref<216x1024xf32, #tpu.memory_space<vmem>>, vector<8x1024xf32>,
    %c0_26 = arith.constant 0 : index
    %c935 = arith.constant 935 : index
    %25 = vector.load %arg8[%c0_26, %c935] : memref<8x3072xf32, #tpu.memory_space<vmem>>, vector<8x1024xf32>
    %c64 = arith.constant 64 : index
    %c0_27 = arith.constant 0 : index
    %26 = vector.load %arg9[%c64, %c0_27] : memref<216x1024xf32, #tpu.memory_space<vmem>>, vector<8x1024xf32>
    tpu.vector_store %arg9[%c64, %c0_27], %25 {strides = array<i32>} : memref<216x1024xf32, #tpu.memory_space<vmem>>, vector<8x1024xf32>,
    %c0_28 = arith.constant 0 : index
    %c1013 = arith.constant 1013 : index
    %27 = vector.load %arg8[%c0_28, %c1013] : memref<8x3072xf32, #tpu.memory_space<vmem>>, vector<8x1024xf32>
    %c72 = arith.constant 72 : index
    %c0_29 = arith.constant 0 : index
    %28 = vector.load %arg9[%c72, %c0_29] : memref<216x1024xf32, #tpu.memory_space<vmem>>, vector<8x1024xf32>
    tpu.vector_store %arg9[%c72, %c0_29], %27 {strides = array<i32>} : memref<216x1024xf32, #tpu.memory_space<vmem>>, vector<8x1024xf32>,
    %c0_30 = arith.constant 0 : index
    %c1014 = arith.constant 1014 : index
    %29 = vector.load %arg8[%c0_30, %c1014] : memref<8x3072xf32, #tpu.memory_space<vmem>>, vector<8x1024xf32>
    %c80 = arith.constant 80 : index
    %c0_31 = arith.constant 0 : index
    %30 = vector.load %arg9[%c80, %c0_31] : memref<216x1024xf32, #tpu.memory_space<vmem>>, vector<8x1024xf32>
    tpu.vector_store %arg9[%c80, %c0_31], %29 {strides = array<i32>} : memref<216x1024xf32, #tpu.memory_space<vmem>>, vector<8x1024xf32>,
    %c0_32 = arith.constant 0 : index
    %c1015 = arith.constant 1015 : index
    %31 = vector.load %arg8[%c0_32, %c1015] : memref<8x3072xf32, #tpu.memory_space<vmem>>, vector<8x1024xf32>
    %c88 = arith.constant 88 : index
    %c0_33 = arith.constant 0 : index
    %32 = vector.load %arg9[%c88, %c0_33] : memref<216x1024xf32, #tpu.memory_space<vmem>>, vector<8x1024xf32>
    tpu.vector_store %arg9[%c88, %c0_33], %31 {strides = array<i32>} : memref<216x1024xf32, #tpu.memory_space<vmem>>, vector<8x1024xf32>,
    %c0_34 = arith.constant 0 : index
    %c1023 = arith.constant 1023 : index
    %33 = vector.load %arg8[%c0_34, %c1023] : memref<8x3072xf32, #tpu.memory_space<vmem>>, vector<8x1024xf32>
    %c96 = arith.constant 96 : index
    %c0_35 = arith.constant 0 : index
    %34 = vector.load %arg9[%c96, %c0_35] : memref<216x1024xf32, #tpu.memory_space<vmem>>, vector<8x1024xf32>
    tpu.vector_store %arg9[%c96, %c0_35], %33 {strides = array<i32>} : memref<216x1024xf32, #tpu.memory_space<vmem>>, vector<8x1024xf32>,
    %c0_36 = arith.constant 0 : index
    %c1024_37 = arith.constant 1024 : index
    %35 = vector.load %arg8[%c0_36, %c1024_37] : memref<8x3072xf32, #tpu.memory_space<vmem>>, vector<8x1024xf32>
    %c104 = arith.constant 104 : index
    %c0_38 = arith.constant 0 : index
    %36 = vector.load %arg9[%c104, %c0_38] : memref<216x1024xf32, #tpu.memory_space<vmem>>, vector<8x1024xf32>
    tpu.vector_store %arg9[%c104, %c0_38], %35 {strides = array<i32>} : memref<216x1024xf32, #tpu.memory_space<vmem>>, vector<8x1024xf32>,
    %c0_39 = arith.constant 0 : index
    %c1025 = arith.constant 1025 : index
    %37 = vector.load %arg8[%c0_39, %c1025] : memref<8x3072xf32, #tpu.memory_space<vmem>>, vector<8x1024xf32>
    %c112 = arith.constant 112 : index
    %c0_40 = arith.constant 0 : index
    %38 = vector.load %arg9[%c112, %c0_40] : memref<216x1024xf32, #tpu.memory_space<vmem>>, vector<8x1024xf32>
    tpu.vector_store %arg9[%c112, %c0_40], %37 {strides = array<i32>} : memref<216x1024xf32, #tpu.memory_space<vmem>>, vector<8x1024xf32>,
    %c0_41 = arith.constant 0 : index
    %c1033 = arith.constant 1033 : index
    %39 = vector.load %arg8[%c0_41, %c1033] : memref<8x3072xf32, #tpu.memory_space<vmem>>, vector<8x1024xf32>
    %c120 = arith.constant 120 : index
    %c0_42 = arith.constant 0 : index
    %40 = vector.load %arg9[%c120, %c0_42] : memref<216x1024xf32, #tpu.memory_space<vmem>>, vector<8x1024xf32>
    tpu.vector_store %arg9[%c120, %c0_42], %39 {strides = array<i32>} : memref<216x1024xf32, #tpu.memory_space<vmem>>, vector<8x1024xf32>,
    %c0_43 = arith.constant 0 : index
    %c1034 = arith.constant 1034 : index
    %41 = vector.load %arg8[%c0_43, %c1034] : memref<8x3072xf32, #tpu.memory_space<vmem>>, vector<8x1024xf32>
    %c128 = arith.constant 128 : index
    %c0_44 = arith.constant 0 : index
    %42 = vector.load %arg9[%c128, %c0_44] : memref<216x1024xf32, #tpu.memory_space<vmem>>, vector<8x1024xf32>
    tpu.vector_store %arg9[%c128, %c0_44], %41 {strides = array<i32>} : memref<216x1024xf32, #tpu.memory_space<vmem>>, vector<8x1024xf32>,
    %c0_45 = arith.constant 0 : index
    %c1035 = arith.constant 1035 : index
    %43 = vector.load %arg8[%c0_45, %c1035] : memref<8x3072xf32, #tpu.memory_space<vmem>>, vector<8x1024xf32>
    %c136 = arith.constant 136 : index
    %c0_46 = arith.constant 0 : index
    %44 = vector.load %arg9[%c136, %c0_46] : memref<216x1024xf32, #tpu.memory_space<vmem>>, vector<8x1024xf32>
    tpu.vector_store %arg9[%c136, %c0_46], %43 {strides = array<i32>} : memref<216x1024xf32, #tpu.memory_space<vmem>>, vector<8x1024xf32>,
    %c0_47 = arith.constant 0 : index
    %c1113 = arith.constant 1113 : index
    %45 = vector.load %arg8[%c0_47, %c1113] : memref<8x3072xf32, #tpu.memory_space<vmem>>, vector<8x1024xf32>
    %c144 = arith.constant 144 : index
    %c0_48 = arith.constant 0 : index
    %46 = vector.load %arg9[%c144, %c0_48] : memref<216x1024xf32, #tpu.memory_space<vmem>>, vector<8x1024xf32>
    tpu.vector_store %arg9[%c144, %c0_48], %45 {strides = array<i32>} : memref<216x1024xf32, #tpu.memory_space<vmem>>, vector<8x1024xf32>,
    %c0_49 = arith.constant 0 : index
    %c1114 = arith.constant 1114 : index
    %47 = vector.load %arg8[%c0_49, %c1114] : memref<8x3072xf32, #tpu.memory_space<vmem>>, vector<8x1024xf32>
    %c152 = arith.constant 152 : index
    %c0_50 = arith.constant 0 : index
    %48 = vector.load %arg9[%c152, %c0_50] : memref<216x1024xf32, #tpu.memory_space<vmem>>, vector<8x1024xf32>
    tpu.vector_store %arg9[%c152, %c0_50], %47 {strides = array<i32>} : memref<216x1024xf32, #tpu.memory_space<vmem>>, vector<8x1024xf32>,
    %c0_51 = arith.constant 0 : index
    %c1115 = arith.constant 1115 : index
    %49 = vector.load %arg8[%c0_51, %c1115] : memref<8x3072xf32, #tpu.memory_space<vmem>>, vector<8x1024xf32>
    %c160 = arith.constant 160 : index
    %c0_52 = arith.constant 0 : index
    %50 = vector.load %arg9[%c160, %c0_52] : memref<216x1024xf32, #tpu.memory_space<vmem>>, vector<8x1024xf32>
    tpu.vector_store %arg9[%c160, %c0_52], %49 {strides = array<i32>} : memref<216x1024xf32, #tpu.memory_space<vmem>>, vector<8x1024xf32>,
    %c0_53 = arith.constant 0 : index
    %c1123 = arith.constant 1123 : index
    %51 = vector.load %arg8[%c0_53, %c1123] : memref<8x3072xf32, #tpu.memory_space<vmem>>, vector<8x1024xf32>
    %c168 = arith.constant 168 : index
    %c0_54 = arith.constant 0 : index
    %52 = vector.load %arg9[%c168, %c0_54] : memref<216x1024xf32, #tpu.memory_space<vmem>>, vector<8x1024xf32>
    tpu.vector_store %arg9[%c168, %c0_54], %51 {strides = array<i32>} : memref<216x1024xf32, #tpu.memory_space<vmem>>, vector<8x1024xf32>,
    %c0_55 = arith.constant 0 : index
    %c1124 = arith.constant 1124 : index
    %53 = vector.load %arg8[%c0_55, %c1124] : memref<8x3072xf32, #tpu.memory_space<vmem>>, vector<8x1024xf32>
    %c176 = arith.constant 176 : index
    %c0_56 = arith.constant 0 : index
    %54 = vector.load %arg9[%c176, %c0_56] : memref<216x1024xf32, #tpu.memory_space<vmem>>, vector<8x1024xf32>
    tpu.vector_store %arg9[%c176, %c0_56], %53 {strides = array<i32>} : memref<216x1024xf32, #tpu.memory_space<vmem>>, vector<8x1024xf32>,
    %c0_57 = arith.constant 0 : index
    %c1125 = arith.constant 1125 : index
    %55 = vector.load %arg8[%c0_57, %c1125] : memref<8x3072xf32, #tpu.memory_space<vmem>>, vector<8x1024xf32>
    %c184 = arith.constant 184 : index
    %c0_58 = arith.constant 0 : index
    %56 = vector.load %arg9[%c184, %c0_58] : memref<216x1024xf32, #tpu.memory_space<vmem>>, vector<8x1024xf32>
    tpu.vector_store %arg9[%c184, %c0_58], %55 {strides = array<i32>} : memref<216x1024xf32, #tpu.memory_space<vmem>>, vector<8x1024xf32>,
    %c0_59 = arith.constant 0 : index
    %c1133 = arith.constant 1133 : index
    %57 = vector.load %arg8[%c0_59, %c1133] : memref<8x3072xf32, #tpu.memory_space<vmem>>, vector<8x1024xf32>
    %c192 = arith.constant 192 : index
    %c0_60 = arith.constant 0 : index
    %58 = vector.load %arg9[%c192, %c0_60] : memref<216x1024xf32, #tpu.memory_space<vmem>>, vector<8x1024xf32>
    tpu.vector_store %arg9[%c192, %c0_60], %57 {strides = array<i32>} : memref<216x1024xf32, #tpu.memory_space<vmem>>, vector<8x1024xf32>,
    %c0_61 = arith.constant 0 : index
    %c1134 = arith.constant 1134 : index
    %59 = vector.load %arg8[%c0_61, %c1134] : memref<8x3072xf32, #tpu.memory_space<vmem>>, vector<8x1024xf32>
    %c200 = arith.constant 200 : index
    %c0_62 = arith.constant 0 : index
    %60 = vector.load %arg9[%c200, %c0_62] : memref<216x1024xf32, #tpu.memory_space<vmem>>, vector<8x1024xf32>
    tpu.vector_store %arg9[%c200, %c0_62], %59 {strides = array<i32>} : memref<216x1024xf32, #tpu.memory_space<vmem>>, vector<8x1024xf32>,
    %c0_63 = arith.constant 0 : index
    %c1135 = arith.constant 1135 : index
    %61 = vector.load %arg8[%c0_63, %c1135] : memref<8x3072xf32, #tpu.memory_space<vmem>>, vector<8x1024xf32>
    %c208 = arith.constant 208 : index
    %c0_64 = arith.constant 0 : index
    %62 = vector.load %arg9[%c208, %c0_64] : memref<216x1024xf32, #tpu.memory_space<vmem>>, vector<8x1024xf32>
    tpu.vector_store %arg9[%c208, %c0_64], %61 {strides = array<i32>} : memref<216x1024xf32, #tpu.memory_space<vmem>>, vector<8x1024xf32>,
    %c0_65 = arith.constant 0 : index
    %c0_66 = arith.constant 0 : index
    %63 = vector.load %arg5[%c0_65, %c0_66] : memref<2x216xf32, #tpu.memory_space<vmem>>, vector<2x216xf32>
    %c0_67 = arith.constant 0 : index
    %c0_68 = arith.constant 0 : index
    %64 = vector.load %arg9[%c0_67, %c0_68] : memref<216x1024xf32, #tpu.memory_space<vmem>>, vector<216x1024xf32>
    %cst = arith.constant dense<0.000000e+00> : vector<2x1024xf32>
    %65 = tpu.matmul %63, %64, %cst {dimension_numbers = #tpu.dot_dimension_numbers<[1], [0], [0], [1], [0, 0, 1, 1], [], []>} : vector<2x216xf32>, vector<216x1024xf32>, vector<2x1024xf32> -> vector<2x1024xf32>
    %c0_69 = arith.constant 0 : index
    %c0_70 = arith.constant 0 : index
    %66 = vector.load %arg1[%c0_69, %c0_70] : memref<1x1024xbf16, #tpu.memory_space<vmem>>, vector<1x1024xbf16>
    %67 = arith.extf %66 : vector<1x1024xbf16> to vector<1x1024xf32>
    %68 = vector.broadcast %67 : vector<1x1024xf32> to vector<2x1024xf32>
    %69 = arith.mulf %65, %68 : vector<2x1024xf32>
    %70 = arith.truncf %69 : vector<2x1024xf32> to vector<2x1024xbf16>
    %c0_71 = arith.constant 0 : index
    %c0_72 = arith.constant 0 : index
    %71 = vector.load %arg6[%c0_71, %c0_72] : memref<2x1024xbf16, #tpu.memory_space<vmem>>, vector<2x1024xbf16>
    tpu.vector_store %arg6[%c0_71, %c0_72], %70 {strides = array<i32>} : memref<2x1024xbf16, #tpu.memory_space<vmem>>, vector<2x1024xbf16>,
    %cst_73 = arith.constant dense<0.000000e+00> : vector<2xf32>
    %72 = vector.multi_reduction <add>, %69, %cst_73 [1] : vector<2x1024xf32> to vector<2xf32>
    %73 = vector.shape_cast %72 : vector<2xf32> to vector<2x1xf32>
    %74 = arith.mulf %69, %69 : vector<2x1024xf32>
    %cst_74 = arith.constant dense<0.000000e+00> : vector<2xf32>
    %75 = vector.multi_reduction <add>, %74, %cst_74 [1] : vector<2x1024xf32> to vector<2xf32>
    %76 = vector.shape_cast %75 : vector<2xf32> to vector<2x1xf32>
    %77 = tpu.concatenate %73, %76 in 1 : vector<2x1xf32>, vector<2x1xf32> -> vector<2x2xf32>
    %c0_75 = arith.constant 0 : index
    %c0_76 = arith.constant 0 : index
    %c0_77 = arith.constant 0 : index
    %78 = vector.load %arg7[%c0_75, %c0_76, %c0_77] : memref<1x2x2xf32, #tpu.memory_space<vmem>>, vector<1x2x2xf32>
    %79 = vector.shape_cast %78 : vector<1x2x2xf32> to vector<2x2xf32>
    %80 = vector.shape_cast %77 : vector<2x2xf32> to vector<1x2x2xf32>
    tpu.vector_store %arg7[%c0_75, %c0_76, %c0_77], %80 {strides = array<i32>} : memref<1x2x2xf32, #tpu.memory_space<vmem>>, vector<1x2x2xf32>,
    return
  }
  func.func @transform_0(%arg0: i32) -> (i32, i32) {
    %c0_i32 = arith.constant 0 : i32
    %c0_i32_0 = arith.constant 0 : i32
    return %c0_i32, %arg0 : i32, i32
  }
  func.func @transform_1(%arg0: i32) -> (i32, i32) {
    %c1_i32 = arith.constant 1 : i32
    %0 = arith.subi %arg0, %c1_i32 : i32
    %c0_i32 = arith.constant 0 : i32
    %1 = arith.maxsi %0, %c0_i32 : i32
    %c0_i32_0 = arith.constant 0 : i32
    %c0_i32_1 = arith.constant 0 : i32
    return %c0_i32_0, %1 : i32, i32
  }
  func.func @transform_2(%arg0: i32) -> (i32, i32) {
    %c0_i32 = arith.constant 0 : i32
    %c0_i32_0 = arith.constant 0 : i32
    return %c0_i32, %arg0 : i32, i32
  }
  func.func @transform_3(%arg0: i32) -> (i32, i32) {
    %c1_i32 = arith.constant 1 : i32
    %0 = arith.addi %arg0, %c1_i32 : i32
    %c1_i32_0 = arith.constant 1 : i32
    %1 = arith.minsi %0, %c1_i32_0 : i32
    %c0_i32 = arith.constant 0 : i32
    %c0_i32_1 = arith.constant 0 : i32
    return %c0_i32, %1 : i32, i32
  }
  func.func @transform_4(%arg0: i32) -> (i32, i32) {
    %c0_i32 = arith.constant 0 : i32
    %c0_i32_0 = arith.constant 0 : i32
    %c0_i32_1 = arith.constant 0 : i32
    return %c0_i32, %c0_i32_0 : i32, i32
  }
  func.func @transform_5(%arg0: i32) -> (i32, i32) {
    %c0_i32 = arith.constant 0 : i32
    %c0_i32_0 = arith.constant 0 : i32
    return %c0_i32, %arg0 : i32, i32
  }
  func.func @transform_6(%arg0: i32) -> (i32, i32, i32) {
    %c0_i32 = arith.constant 0 : i32
    %c0_i32_0 = arith.constant 0 : i32
    %c0_i32_1 = arith.constant 0 : i32
    return %arg0, %c0_i32, %c0_i32_0 : i32, i32, i32
  }
}

module attributes {stable_mosaic.version = 11 : i64} {
  func.func @_bn_act_deconv_kernel(%arg0: i32, %arg1: memref<2x1024xbf16, #tpu.memory_space<vmem>>, %arg2: memref<16x5xf32, #tpu.memory_space<vmem>>, %arg3: memref<16x1024xbf16, #tpu.memory_space<vmem>>) attributes {dimension_semantics = [#tpu.dimension_semantics<parallel>], iteration_bounds = array<i64: 2>, scalar_prefetch = 0 : i64, scratch_operands = 0 : i64, tpu.core_type = #tpu.core_type<tc>, window_params = [{transform_indices = @transform_0, window_bounds = array<i64: 2, 1024>}, {pipeline_mode = #tpu.pipeline_mode<synchronous>, transform_indices = @transform_1, window_bounds = array<i64: 16, 5>}, {transform_indices = @transform_2, window_bounds = array<i64: 16, 1024>}]} {
    %c0 = arith.constant 0 : index
    %c0_0 = arith.constant 0 : index
    %0 = vector.load %arg2[%c0, %c0_0] : memref<16x5xf32, #tpu.memory_space<vmem>>, vector<16x2xf32>
    %c0_1 = arith.constant 0 : index
    %c2 = arith.constant 2 : index
    %1 = vector.load %arg2[%c0_1, %c2] : memref<16x5xf32, #tpu.memory_space<vmem>>, vector<16x1xf32>
    %c0_2 = arith.constant 0 : index
    %c3 = arith.constant 3 : index
    %2 = vector.load %arg2[%c0_2, %c3] : memref<16x5xf32, #tpu.memory_space<vmem>>, vector<2x1xf32>
    %c0_3 = arith.constant 0 : index
    %c4 = arith.constant 4 : index
    %3 = vector.load %arg2[%c0_3, %c4] : memref<16x5xf32, #tpu.memory_space<vmem>>, vector<2x1xf32>
    %c0_4 = arith.constant 0 : index
    %c0_5 = arith.constant 0 : index
    %4 = vector.load %arg1[%c0_4, %c0_5] : memref<2x1024xbf16, #tpu.memory_space<vmem>>, vector<2x1024xbf16>
    %5 = arith.extf %4 : vector<2x1024xbf16> to vector<2x1024xf32>
    %6 = vector.broadcast %2 : vector<2x1xf32> to vector<2x1024xf32>
    %7 = arith.mulf %5, %6 : vector<2x1024xf32>
    %8 = vector.broadcast %3 : vector<2x1xf32> to vector<2x1024xf32>
    %9 = arith.addf %7, %8 : vector<2x1024xf32>
    %cst = arith.constant 0.000000e+00 : f32
    %10 = vector.broadcast %cst : f32 to vector<2x1024xf32>
    %11 = arith.cmpf ogt, %9, %10 : vector<2x1024xf32>
    %cst_6 = arith.constant 0.00999999977 : f32
    %12 = vector.broadcast %cst_6 : f32 to vector<2x1024xf32>
    %13 = arith.mulf %12, %9 : vector<2x1024xf32>
    %14 = arith.select %11, %9, %13 : vector<2x1024xi1>, vector<2x1024xf32>
    %15 = vector.extract_strided_slice %0 {offsets = [0, 0], sizes = [16, 1], strides = [1, 1]} : vector<16x2xf32> to vector<16x1xf32>
    %16 = vector.extract_strided_slice %14 {offsets = [0, 0], sizes = [1, 1024], strides = [1, 1]} : vector<2x1024xf32> to vector<1x1024xf32>
    %17 = vector.broadcast %15 : vector<16x1xf32> to vector<16x1024xf32>
    %18 = vector.broadcast %16 : vector<1x1024xf32> to vector<16x1024xf32>
    %19 = arith.mulf %17, %18 : vector<16x1024xf32>
    %20 = vector.extract_strided_slice %0 {offsets = [0, 1], sizes = [16, 1], strides = [1, 1]} : vector<16x2xf32> to vector<16x1xf32>
    %21 = vector.extract_strided_slice %14 {offsets = [1, 0], sizes = [1, 1024], strides = [1, 1]} : vector<2x1024xf32> to vector<1x1024xf32>
    %22 = vector.broadcast %20 : vector<16x1xf32> to vector<16x1024xf32>
    %23 = vector.broadcast %21 : vector<1x1024xf32> to vector<16x1024xf32>
    %24 = arith.mulf %22, %23 : vector<16x1024xf32>
    %25 = arith.addf %19, %24 : vector<16x1024xf32>
    %26 = vector.broadcast %1 : vector<16x1xf32> to vector<16x1024xf32>
    %27 = arith.addf %25, %26 : vector<16x1024xf32>
    %28 = arith.truncf %27 : vector<16x1024xf32> to vector<16x1024xbf16>
    %c0_7 = arith.constant 0 : index
    %c0_8 = arith.constant 0 : index
    %29 = vector.load %arg3[%c0_7, %c0_8] : memref<16x1024xbf16, #tpu.memory_space<vmem>>, vector<16x1024xbf16>
    tpu.vector_store %arg3[%c0_7, %c0_8], %28 {strides = array<i32>} : memref<16x1024xbf16, #tpu.memory_space<vmem>>, vector<16x1024xbf16>,
    return
  }
  func.func @transform_0(%arg0: i32) -> (i32, i32) {
    %c0_i32 = arith.constant 0 : i32
    %c0_i32_0 = arith.constant 0 : i32
    return %c0_i32, %arg0 : i32, i32
  }
  func.func @transform_1(%arg0: i32) -> (i32, i32) {
    %c0_i32 = arith.constant 0 : i32
    %c0_i32_0 = arith.constant 0 : i32
    %c0_i32_1 = arith.constant 0 : i32
    return %c0_i32, %c0_i32_0 : i32, i32
  }
  func.func @transform_2(%arg0: i32) -> (i32, i32) {
    %c0_i32 = arith.constant 0 : i32
    %c0_i32_0 = arith.constant 0 : i32
    return %c0_i32, %arg0 : i32, i32
  }
}

</mosaic_0001>

<bundles_post_ra>
// kernel: tile.0
= control target key start
LH: loop header
LB: loop body
LE: loop exit
PB: predicated region body
PF: predicated region fallthrough
CT: control target
= control target key end

     0   :  { %vm3_vm0 = vcmask 7168   ;;  %s13_s9 = smov 127   ;;  %s33_s0 = inlined_call_operand.vmem [shape: f32[8,2], index: 0, kind: input, shape index: {}]   ;;  %s34_s1 = inlined_call_operand.vmem [shape: f32[16,1], index: 1, kind: output, shape index: {}]  }
   0x1   :  { %v2_v0 = vld [vmem:[%s33_s0] sm:$0xff]  }
   0x2   :  { %4 = vst.msk [vmem:[%s34_s1] ss:$2 sm:$0xff] %vm3_vm0, %v2_v0   ;;  %6 = vrot.lane.b32.xlu0 %v2_v0, %s13_s9 }
  0x74   :  { %v7_v1 = vpop.permute.xlu0 %6  }
  0x75   :  { %11 = vst.msk [vmem:[%s34_s1 + $0x1] ss:$2 sm:$0xff] %vm3_vm0, %v7_v1  }

// kernel: tile.8
= control target key start
LH: loop header
LB: loop body
LE: loop exit
PB: predicated region body
PF: predicated region fallthrough
CT: control target
= control target key end

     0   :  { %2 = vsyncpa [#allocation1], 0  ;;  %s44_s6 = smov [#allocation0]   ;;  %s70_s0 = inlined_call_operand.hbm [shape: f32[2], index: 0, kind: input, shape index: {}]   ;;  %s71_s1 = inlined_call_operand.vmem [shape: f32[8,2], index: 1, kind: output, shape index: {}]  }
   0x1   :  { %s9_s7 = sshll.u32 %s44_s6, 4  ;;  %s20_s10 = scalar_lea.hbm %s70_s0, 16  ;;  %s10_s7 = int_to_ptr.vmem [resolvable:$true] %s9_s7 }
   0x2   :  { %p21_p0 = scmp.ne.s32.totalorder %s70_s0, %s20_s10  ;;  %p24_p1 = scmp.lt.u32.totalorder %s20_s10, %s70_s0 }
   0x4   :  { %p26_p2 = pnand %p24_p1, %p21_p0 }
   0x6   :  { %29 = shalt.err (!%p26_p2)
}
   0x7   :  { %s30_s15 = scalar_lea.vmem %s10_s7, 16  ;;  %s34_s16 = scalar_lea.vmem %s10_s7, 32 }
   0x8   :  { %p31_p3 = scmp.ne.s32.totalorder %s10_s7, %s30_s15  ;;  %p35_p4 = scmp.lt.s32.totalorder %s10_s7, %s10_s7 }
   0x9   :  { %p36_p5 = scmp.lt.s32.totalorder %s34_s16, %s30_s15 }
   0xb   :  { %p37_p6 = por %p36_p5, %p35_p4 }
   0xd   :  { %p38_p7 = pnand %p37_p6, %p31_p3 }
   0xf   :  { %41 = shalt.err (!%p38_p7)
}
  0x10   :  { %12 = dma.hbm_to_vmem [thread:$0]  %s70_s0, 16, %s10_s7, [#allocation1]  }
  0x11   :  { %42 = dma.done.wait [#allocation1], 16  }
  0x12   :  { %43 = vsyncadd [#allocation1], 4294967280  ;;  %v16_v0 = vld [vmem:[#allocation0] ss:$0 sm:$0xff] }
  0x13   :  { %17 = vst [vmem:[%s71_s1] sm:$0xff] %v16_v0 }
  0x14   :  { %18 = vsyncpa [#allocation1], 1 }

// kernel: upsample_layer.3
= control target key start
LH: loop header
LB: loop body
LE: loop exit
PB: predicated region body
PF: predicated region fallthrough
CT: control target
= control target key end

     0   :  { %s668_s9 = smov 0   ;;  %s670_s10 = smov 0   ;;  %s787_s0 = inlined_call_operand.vmem [shape: bf16[2,2048], index: 0, kind: input, shape index: {}]   ;;  %s788_s1 = inlined_call_operand.vmem [shape: f32[16,5], index: 1, kind: input, shape index: {}]   ;;  %s789_s2 = inlined_call_operand.vmem [shape: bf16[16,2048], index: 2, kind: output, shape index: {}]  }
   0x1   :  { %s672_s11 = smov 0  }
   0x2 LB: > { %s681_s12 = sadd.s32 4294967295, %s645_s11   ;;  %s683_s13 = sadd.s32 1, %s645_s11   ;;  %s645_s11 = sphi %s672_s11, %s793_s11   ;;  %s641_s10 = sphi %s670_s10, %s792_s10   ;;  %s637_s9 = sphi %s668_s9, %s791_s9  }
   0x3   : > { %s63_s14 = ssub.s32 %s645_s11, %s683_s13  ;;  %s66_s15 = sadd.s32 1, %s641_s10 }
   0x4   : > { %p64_p0 = scmp.eq.s32.totalorder %s63_s14, 0  ;;  %p76_p1 = scmp.ne.s32.totalorder %s641_s10, %s637_s9 }
   0x5   : > { %p77_p2 = scmp.eq.s32.totalorder %s681_s12, 1  ;;  %p561_p3 = scmp.ge.s32.totalorder %s645_s11, 1 }
   0x6   : > { %s691_s16 = scalar_select %p64_p0, %s641_s10, %s66_s15  }
   0x7   : > { %p693_p4 = por %p77_p2, %p76_p1  ;;  %p112_p5 = scmp.lt.s32.totalorder %s645_s11, 3 }
   0x9   : > { %p113_p6 = pnand %p561_p3, %p112_p5 }
   0xa   : > { %v140_v0 = vld [vmem:[%s788_s1] sm:$0x3] (!%p113_p6)  ;;  %v647_v2 = vmov (!%p113_p6), 0   ;;  %v648_v3 = vmov (!%p113_p6), 3   ;;  %v139_v4 = vld [vmem:[%s788_s1 + $0x8] sm:$0xff] (!%p113_p6)  ;;  %v649_v5 = vmov (!%p113_p6), 4   ;;  %v151_v10 = vlaneseq (!%p113_p6) }
   0xb   : > { %116 = sbr.rel (%p113_p6) target bundleno = 190 (0xbe), region = 28  ;;  %v138_v1 = vld [vmem:[%s788_s1] sm:$0xff] (!%p113_p6)  ;;  %618 = vset.pattern.permute.xlu1 (!%p113_p6), %v647_v2  ;;  %616 = vset.pattern.permute.xlu0 (!%p113_p6), %v648_v3  ;;  %v650_v6 = vmov (!%p113_p6), 1   ;;  %v651_v7 = vmov (!%p113_p6), 2   ;;  %s563_s24 = sshll.u32 (!%p113_p6), %s681_s12, 3 }
   0xc   : > { %146 = vperm.xlu0 (!%p113_p6), %616, %v140_v0   ;;  %179 = vperm.xlu1 (!%p113_p6), %618, %v138_v1   ;;  %p133_p7 = scmp.lt.s32.totalorder (!%p113_p6), %s563_s24, 15  ;;  %v652_v8 = vmov (!%p113_p6), 269488144   ;;  %v152_v12 = vshrl.u32 (!%p113_p6), %v151_v10, 7  ;;  %s129_s28 = sand.u32 (!%p113_p6), 1, %s637_s9  }
   0xd   : > { %v149_v9 = vunpack.c.l.s4 (!%p113_p6), %v652_v8  ;;  %s562_s29 = sshll.u32 (!%p113_p6), %s129_s28, 6 }
   0xe   : > { %v191_v25 = vsub.s32 (!%p113_p6), 0, %v152_v12  ;;  %v195_v26 = vsub.s32 (!%p113_p6), 2, %v152_v12  ;;  %v199_v27 = vsub.s32 (!%p113_p6), 4, %v152_v12  ;;  %v203_v28 = vsub.s32 (!%p113_p6), 6, %v152_v12  ;;  %s745_s30 = scalar_lea.vmem (!%p113_p6), [#allocation2], %s562_s29 }
   0xf   : > { %v150_v11 = vunpack.c.0.s8 (!%p113_p6), %v149_v9  ;;  %v287_v31 = vsub.s32 (!%p113_p6), 1, %v152_v12  ;;  %v291_v32 = vsub.s32 (!%p113_p6), 3, %v152_v12  ;;  %v295_v36 = vsub.s32 (!%p113_p6), 5, %v152_v12 }
  0x10   : > { %617 = vset.pattern.permute.xlu0 (!%p113_p6), %v649_v5  ;;  %184 = vperm.xlu1 (!%p113_p6), %618, %v139_v4   ;;  %v299_v37 = vsub.s32 (!%p113_p6), 7, %v152_v12 }
  0x11   : > { %159 = vperm.xlu0 (!%p113_p6), %617, %v140_v0   ;;  %v153_v13 = vsub.s32 (!%p113_p6), %v150_v11, %v152_v12 }
  0x12   : > { %s795_s24 = smov (!%p133_p7, %s563_s24), 15  ;;  %s585_s3 = sshll.u32 (%p693_p4), %s681_s12, 5 }
  0x13   : > { %s135_s27 = scalar_lea.vmem %s787_s0, %s795_s24  ;;  %s478_s6 = scalar_lea.vmem (%p693_p4), %s789_s2, %s585_s3 }
  0x14   : > { %619 = vset.pattern.permute.xlu1 %v650_v6  ;;  %v141_v14 = vld [vmem:[%s135_s27] sm:$0xff] }
  0x15   : > { %278 = vperm.xlu1 %619, %v138_v1   ;;  %620 = vset.pattern.permute.xlu0 %v650_v6  ;;  %v142_v16 = vunpack.c.l.bf16 %v141_v14  ;;  %v143_v17 = vunpack.c.h.bf16 %v141_v14 }
  0x16   : > { %282 = vperm.xlu0 %620, %v139_v4  }
  0x19   : > { %621 = vset.pattern.permute.xlu1 %v651_v7 }
  0x1a   : > { %390 = vperm.xlu1 %621, %v138_v1   ;;  %622 = vset.pattern.permute.xlu0 %v651_v7 }
  0x1e   : > { %394 = vperm.xlu1 %621, %v139_v4  }
  0x8b   : > { %v147_v15 = vpop.permute.xlu0 %146  ;;  %v180_v33 = vpop.permute.xlu1 %179 }
  0x8c   : > { %v154_v18 = vrot.slane %v147_v15, %v153_v13 }
  0x8e   : > { %v156_v20 = vmul.f32 %v154_v18, %v142_v16  ;;  %v157_v21 = vmul.f32 %v154_v18, %v143_v17 }
  0x8f   : > { %v730_v58 = vpop.permute.xlu1 %184 }
  0x90   : > { %v160_v19 = vpop.permute.xlu0 %159 }
  0x91   : > { %v167_v22 = vrot.slane %v160_v19, %v153_v13 }
  0x93   : > { %v169_v23 = vadd.f32 %v167_v22, %v156_v20  ;;  %v170_v24 = vadd.f32 %v167_v22, %v157_v21 }
  0x94   : > { %v279_v11 = vpop.permute.xlu1 %278 }
  0x95   : > { %vm171_vm0 = vcmp.gt.f32.partialorder %v169_v23, 0.0  ;;  %vm172_vm1 = vcmp.gt.f32.partialorder %v170_v24, 0.0  ;;  %v173_v29 = vmul.f32 0.01, %v169_v23  ;;  %v174_v30 = vmul.f32 0.01, %v170_v24  ;;  %v283_v12 = vpop.permute.xlu0 %282 }
  0x97   : > { %v175_v34 = vsel %vm171_vm0, %v169_v23, %v173_v29  ;;  %v176_v35 = vsel %vm172_vm1, %v170_v24, %v174_v30 }
  0x98   : > { %v192_v38 = vrot.slane %v175_v34, %v191_v25  ;;  %v196_v39 = vrot.slane %v175_v34, %v195_v26  ;;  %v200_v40 = vrot.slane %v175_v34, %v199_v27  ;;  %v204_v41 = vrot.slane %v175_v34, %v203_v28 }
  0x99   : > { %v208_v42 = vrot.slane %v176_v35, %v191_v25  ;;  %v212_v43 = vrot.slane %v176_v35, %v195_v26  ;;  %v216_v44 = vrot.slane %v176_v35, %v199_v27  ;;  %v220_v45 = vrot.slane %v176_v35, %v203_v28 }
  0x9a   : > { %v710_v46 = vrot.slane %v192_v38, %v191_v25  ;;  %v712_v47 = vrot.slane %v196_v39, %v191_v25  ;;  %v714_v48 = vrot.slane %v200_v40, %v191_v25  ;;  %v716_v49 = vrot.slane %v204_v41, %v191_v25 }
  0x9b   : > { %v718_v50 = vrot.slane %v208_v42, %v191_v25  ;;  %v720_v51 = vrot.slane %v212_v43, %v191_v25  ;;  %v722_v52 = vrot.slane %v216_v44, %v191_v25  ;;  %v724_v53 = vrot.slane %v220_v45, %v191_v25 }
  0x9c   : > { %v261_v54 = vmul.f32 %v710_v46, %v180_v33  ;;  %v262_v55 = vmul.f32 %v712_v47, %v180_v33  ;;  %v263_v56 = vmul.f32 %v714_v48, %v180_v33  ;;  %v264_v57 = vmul.f32 %v716_v49, %v180_v33 }
  0x9d   : > { %v265_v59 = vmul.f32 %v718_v50, %v180_v33  ;;  %v266_v60 = vmul.f32 %v720_v51, %v180_v33  ;;  %v267_v61 = vmul.f32 %v722_v52, %v180_v33  ;;  %v268_v62 = vmul.f32 %v724_v53, %v180_v33 }
  0x9e   : > { %v288_v63 = vrot.slane %v175_v34, %v287_v31  ;;  %v292_v0 = vrot.slane %v175_v34, %v291_v32  ;;  %v296_v1 = vrot.slane %v175_v34, %v295_v36  ;;  %v300_v2 = vrot.slane %v175_v34, %v299_v37 }
  0x9f   : > { %v304_v3 = vrot.slane %v176_v35, %v287_v31  ;;  %v308_v4 = vrot.slane %v176_v35, %v291_v32  ;;  %v312_v5 = vrot.slane %v176_v35, %v295_v36  ;;  %v316_v6 = vrot.slane %v176_v35, %v299_v37  ;;  %v391_v37 = vpop.permute.xlu1 %390 }
  0xa0   : > { %v328_v7 = vrot.slane %v288_v63, %v287_v31  ;;  %v332_v8 = vrot.slane %v292_v0, %v287_v31  ;;  %v336_v9 = vrot.slane %v296_v1, %v287_v31  ;;  %v340_v10 = vrot.slane %v300_v2, %v287_v31 }
  0xa1   : > { %v344_v13 = vrot.slane %v304_v3, %v287_v31  ;;  %v348_v14 = vrot.slane %v308_v4, %v287_v31  ;;  %v352_v15 = vrot.slane %v312_v5, %v287_v31  ;;  %v356_v16 = vrot.slane %v316_v6, %v287_v31 }
  0xa2   : > { %v357_v17 = vmul.f32 %v328_v7, %v279_v11  ;;  %v358_v18 = vmul.f32 %v332_v8, %v279_v11  ;;  %v359_v19 = vmul.f32 %v336_v9, %v279_v11  ;;  %v360_v20 = vmul.f32 %v340_v10, %v279_v11 }
  0xa3   : > { %v361_v21 = vmul.f32 %v344_v13, %v279_v11  ;;  %v362_v22 = vmul.f32 %v348_v14, %v279_v11  ;;  %v363_v23 = vmul.f32 %v352_v15, %v279_v11  ;;  %v364_v24 = vmul.f32 %v356_v16, %v279_v11 }
  0xa4   : > { %v365_v25 = vmul.f32 %v328_v7, %v283_v12  ;;  %v366_v26 = vmul.f32 %v332_v8, %v283_v12  ;;  %v367_v27 = vmul.f32 %v336_v9, %v283_v12  ;;  %v368_v28 = vmul.f32 %v340_v10, %v283_v12  ;;  %v395_v7 = vpop.permute.xlu1 %394 }
  0xa5   : > { %v369_v29 = vmul.f32 %v344_v13, %v283_v12  ;;  %v370_v30 = vmul.f32 %v348_v14, %v283_v12  ;;  %v371_v32 = vmul.f32 %v352_v15, %v283_v12  ;;  %v372_v33 = vmul.f32 %v356_v16, %v283_v12 }
  0xa6   : > { %v373_v34 = vadd.f32 %v357_v17, %v261_v54  ;;  %v374_v31 = vadd.f32 %v358_v18, %v262_v55  ;;  %v375_v35 = vadd.f32 %v359_v19, %v263_v56  ;;  %v376_v36 = vadd.f32 %v360_v20, %v264_v57 }
  0xa7   : > { %v377_v38 = vadd.f32 %v361_v21, %v265_v59  ;;  %v378_v39 = vadd.f32 %v362_v22, %v266_v60  ;;  %v379_v40 = vadd.f32 %v363_v23, %v267_v61  ;;  %v380_v41 = vadd.f32 %v364_v24, %v268_v62 }
  0xa8   : > { %v397_v42 = vadd.f32 %v391_v37, %v373_v34  ;;  %v398_v43 = vadd.f32 %v391_v37, %v374_v31  ;;  %v399_v44 = vadd.f32 %v391_v37, %v375_v35  ;;  %v400_v45 = vadd.f32 %v391_v37, %v376_v36 }
  0xa9   : > { %v401_v63 = vadd.f32 %v391_v37, %v377_v38  ;;  %v402_v0 = vadd.f32 %v391_v37, %v378_v39  ;;  %v403_v1 = vadd.f32 %v391_v37, %v379_v40  ;;  %v404_v2 = vadd.f32 %v391_v37, %v380_v41 }
  0xaa   : > { %v577_v3 = vpack.c.bf16 %v398_v43, %v397_v42  ;;  %v578_v4 = vpack.c.bf16 %v400_v45, %v399_v44  ;;  %v269_v54 = vmul.f32 %v710_v46, %v730_v58  ;;  %v270_v55 = vmul.f32 %v712_v47, %v730_v58 }
  0xab   : > { %v579_v56 = vpack.c.bf16 %v402_v0, %v401_v63  ;;  %v580_v57 = vpack.c.bf16 %v404_v2, %v403_v1  ;;  %v271_v59 = vmul.f32 %v714_v48, %v730_v58  ;;  %v272_v60 = vmul.f32 %v716_v49, %v730_v58 }
  0xac   : > { %461 = vst [vmem:[%s745_s30] sm:$0xff] %v577_v3  ;;  %462 = vst [vmem:[%s745_s30 + $0x8] sm:$0xff] %v578_v4  ;;  %v273_v46 = vmul.f32 %v718_v50, %v730_v58  ;;  %v274_v47 = vmul.f32 %v720_v51, %v730_v58  ;;  %v275_v48 = vmul.f32 %v722_v52, %v730_v58 }
  0xad   : > { %v276_v49 = vmul.f32 %v724_v53, %v730_v58  ;;  %463 = vst [vmem:[%s745_s30 + $0x10] sm:$0xff] %v579_v56  ;;  %464 = vst [vmem:[%s745_s30 + $0x18] sm:$0xff] %v580_v57  ;;  %v381_v61 = vadd.f32 %v365_v25, %v269_v54  ;;  %v382_v62 = vadd.f32 %v366_v26, %v270_v55 }
  0xae   : > { %v383_v5 = vadd.f32 %v367_v27, %v271_v59  ;;  %v384_v6 = vadd.f32 %v368_v28, %v272_v60  ;;  %v385_v8 = vadd.f32 %v369_v29, %v273_v46  ;;  %v386_v9 = vadd.f32 %v370_v30, %v274_v47 }
  0xaf   : > { %v387_v50 = vadd.f32 %v371_v32, %v275_v48  ;;  %v388_v51 = vadd.f32 %v372_v33, %v276_v49  ;;  %v405_v10 = vadd.f32 %v395_v7, %v381_v61  ;;  %v406_v52 = vadd.f32 %v395_v7, %v382_v62  ;;  %475 = sbr.rel (!%p693_p4) target bundleno = 190 (0xbe), region = 32 }
  0xb0   : > { %v407_v11 = vadd.f32 %v395_v7, %v383_v5  ;;  %v408_v12 = vadd.f32 %v395_v7, %v384_v6  ;;  %v409_v53 = vadd.f32 %v395_v7, %v385_v8  ;;  %v410_v58 = vadd.f32 %v395_v7, %v386_v9 }
  0xb1   : > { %v411_v13 = vadd.f32 %v395_v7, %v387_v50  ;;  %v412_v14 = vadd.f32 %v395_v7, %v388_v51  ;;  %v581_v15 = vpack.c.bf16 %v406_v52, %v405_v10 }
  0xb2   : > { %v582_v16 = vpack.c.bf16 %v408_v12, %v407_v11  ;;  %v583_v17 = vpack.c.bf16 %v410_v58, %v409_v53 }
  0xb3   : > { %v584_v18 = vpack.c.bf16 %v412_v14, %v411_v13  ;;  %465 = vst [vmem:[%s745_s30 + $0x20] sm:$0xff] %v581_v15  ;;  %v491_v19 = vld [vmem:[%s745_s30] sm:$0xff] (%p693_p4)  ;;  %v493_v20 = vld [vmem:[%s745_s30 + $0x8] sm:$0xff] (%p693_p4) }
  0xb4   : > { %466 = vst [vmem:[%s745_s30 + $0x28] sm:$0xff] %v582_v16  ;;  %467 = vst [vmem:[%s745_s30 + $0x30] sm:$0xff] %v583_v17  ;;  %v495_v21 = vld [vmem:[%s745_s30 + $0x10] sm:$0xff] (%p693_p4)  ;;  %v497_v22 = vld [vmem:[%s745_s30 + $0x18] sm:$0xff] (%p693_p4) }
  0xb5   : > { %468 = vst [vmem:[%s745_s30 + $0x38] sm:$0xff] %v584_v18  ;;  %492 = vst [vmem:[%s478_s6] sm:$0xff] (%p693_p4), %v491_v19 }
  0xb6   : > { %494 = vst [vmem:[%s478_s6 + $0x8] sm:$0xff] %v493_v20  ;;  %496 = vst [vmem:[%s478_s6 + $0x10] sm:$0xff] %v495_v21 }
  0xb7   : > { %498 = vst [vmem:[%s478_s6 + $0x18] sm:$0xff] %v497_v22 }
  0xba   : > { %v499_v23 = vld [vmem:[%s745_s30 + $0x20] sm:$0xff] }
  0xbb   : > { %v501_v24 = vld [vmem:[%s745_s30 + $0x28] sm:$0xff]  ;;  %500 = vst [vmem:[%s478_s6 + $0x40] sm:$0xff] %v499_v23  ;;  %v503_v25 = vld [vmem:[%s745_s30 + $0x30] sm:$0xff] }
  0xbc   : > { %502 = vst [vmem:[%s478_s6 + $0x48] sm:$0xff] %v501_v24  ;;  %v505_v26 = vld [vmem:[%s745_s30 + $0x38] sm:$0xff]  ;;  %504 = vst [vmem:[%s478_s6 + $0x50] sm:$0xff] %v503_v25 }
  0xbd   : > { %506 = vst [vmem:[%s478_s6 + $0x58] sm:$0xff] %v505_v26 }
  0xbe PF: > { %p9_p8 = scmp.ge.s32.totalorder %s683_s13, 4   ;;  %s791_s9 = smov %s641_s10 }
  0xbf   : > { %s792_s10 = smov %s691_s16  ;;  %s793_s11 = smov %s683_s13 }
  0xc0   :  { %11 = sbr.rel (!%p9_p8) target bundleno = 2 (0x2), region = 81 }

// kernel: upsample_layer.2
= control target key start
LH: loop header
LB: loop body
LE: loop exit
PB: predicated region body
PF: predicated region fallthrough
CT: control target
= control target key end

     0   :  { %s3719_s21 = smov 0   ;;  %s4582_s0 = inlined_call_operand.vmem [shape: bf16[1,2048], index: 0, kind: input, shape index: {}]   ;;  %s4583_s1 = inlined_call_operand.vmem [shape: bf16[8,2048], index: 1, kind: input, shape index: {}, may-alias: {1,2,3}]   ;;  %s4584_s2 = inlined_call_operand.vmem [shape: bf16[8,2048], index: 2, kind: input, shape index: {}, may-alias: {1,2,3}]   ;;  %s4585_s3 = inlined_call_operand.vmem [shape: bf16[8,2048], index: 3, kind: input, shape index: {}, may-alias: {1,2,3}]   ;;  %s4586_s4 = inlined_call_operand.vmem [shape: f32[2,216], index: 4, kind: input, shape index: {}]   ;;  %s4587_s5 = inlined_call_operand.vmem [shape: bf16[2,2048], index: 5, kind: output, shape index: {0}]   ;;  %s4588_s6 = inlined_call_operand.vmem [shape: f32[2,2,2], index: 6, kind: output, shape index: {1}]  }
   0x1 LB: > { %s3725_s22 = sadd.s32 4294967295, %s3655_s21   ;;  %p2863_p0 = scmp.ge.s32.totalorder %s3655_s21, 1  ;;  %s3655_s21 = sphi %s3719_s21, %s17_s21  }
   0x2   : > { %p272_p1 = scmp.lt.s32.totalorder %s3655_s21, 3 }
   0x4   : > { %p273_p2 = pnand %p2863_p0, %p272_p1 }
   0x6   : > { %276 = sbr.rel (%p273_p2) target bundleno = 770 (0x302), region = 40 }
   0xd   : > { %s2864_s23 = sshll.u32 %s3725_s22, 3  ;;  %s2865_s24 = sadd.s32 4294967295, %s3725_s22  ;;  %vm465_vm0 = vcmask 908288   ;;  %vm526_vm1 = vcmask 900096   ;;  %vm587_vm2 = vcmask 891904   ;;  %vm648_vm3 = vcmask 826368  }
   0xe   : > { %p326_p3 = scmp.lt.s32.totalorder %s2864_s23, 15  ;;  %p331_p4 = scmp.gt.s32.totalorder %s2865_s24, 0  ;;  %vm709_vm4 = vcmask 818176   ;;  %vm770_vm5 = vcmask 809984   ;;  %vm2258_vm6 = vcmask 719872   ;;  %vm831_vm7 = vcmask 744448  }
   0xf   : > { %s3657_s30 = smov 111   ;;  %s3658_s11 = smov 110   ;;  %vm892_vm8 = vcmask 736256   ;;  %vm953_vm9 = vcmask 728064   ;;  %vm1014_vm10 = vcmask 89088   ;;  %vm4610_vm11 = vcmask 80896  }
  0x10   : > { %s4716_s23 = smov (!%p326_p3, %s2864_s23), 15  ;;  %s4718_s24 = smov (!%p331_p4, %s2865_s24), 0  ;;  %vm1136_vm12 = vcmask 72704   ;;  %vm4609_vm13 = vcmask 7168   ;;  %vm4615_vm14 = vcmask 1039360   ;;  %vm4616_vm15 = vcmask 973824  }
  0x11   : > { %s2869_s25 = sshll.u32 %s4716_s23, 2  ;;  %s2866_s29 = sshll.u32 %s4718_s24, 3 }
  0x12   : > { %s346_s28 = scalar_lea.vmem %s4584_s2, %s2869_s25  ;;  %p334_p5 = scmp.lt.s32.totalorder %s2866_s29, 15 }
  0x13   : > { %v390_v0 = vld [vmem:[%s346_s28 + $0x8] sm:$0xff]  ;;  %v391_v1 = vld [vmem:[%s346_s28 + $0x10] sm:$0xff]  ;;  %v389_v2 = vld [vmem:[%s346_s28] sm:$0xff]  ;;  %s3659_s12 = smov 101   ;;  %s3660_s13 = smov 109  }
  0x14   : > { %v3737_v3 = vunpack.c.h.bf16 %v390_v0  ;;  %v3739_v4 = vunpack.c.l.bf16 %v391_v1  ;;  %v3741_v5 = vunpack.c.h.bf16 %v391_v1  ;;  %v3743_v6 = vunpack.c.h.bf16 %v389_v2  ;;  %v392_v7 = vld [vmem:[%s346_s28 + $0x18] sm:$0xff]  ;;  %s4720_s29 = smov (!%p334_p5, %s2866_s29), 15  ;;  %s3661_s14 = smov 99  }
  0x15   : > { %v3745_v8 = vunpack.c.l.bf16 %v390_v0  ;;  %v3747_v9 = vunpack.c.l.bf16 %v392_v7  ;;  %v3763_v13 = vunpack.c.h.bf16 %v392_v7  ;;  %s2867_s7 = sshll.u32 %s4720_s29, 2  ;;  %v3768_v14 = vunpack.c.l.bf16 %v389_v2  ;;  %s3662_s15 = smov 100  }
  0x16   : > { %v3751_v10 = vpack.i.bf16 %v3739_v4, %v3737_v3  ;;  %s337_s10 = scalar_lea.vmem %s4583_s1, %s2867_s7  ;;  %s3663_s16 = smov 90   ;;  %v3348_v21 = vpack.i.bf16 %v3741_v5, %v3739_v4 }
  0x17   : > { %v3755_v11 = vpack.i.bf16 %v3745_v8, %v3743_v6  ;;  %v3760_v12 = vpack.i.bf16 %v3747_v9, %v3741_v5  ;;  %v372_v15 = vld [vmem:[%s337_s10 + $0x18] sm:$0xff]  ;;  %v3168_v18 = vpack.i.bf16 %v3743_v6, %v3768_v14  ;;  %s3664_s17 = smov 91   ;;  %s3665_s18 = smov 11   ;;  %v3827_v20 = vpack.i.bf16 %v3737_v3, %v3768_v14 }
  0x18   : > { %3134 = vrot.lane.b32.xlu1 %v3751_v10, %s3657_s30  ;;  %v380_v16 = vunpack.c.h.bf16 %v372_v15  ;;  %s3666_s19 = smov 89   ;;  %s3667_s20 = smov 9  }
  0x19   : > { %3129 = vrot.lane.b32.xlu0 %v3755_v11, %s3657_s30  ;;  %s3668_s24 = smov 10   ;;  %s3669_s25 = smov 1  }
  0x1a   : > { %v3163_v17 = vpack.i.bf16 %v3768_v14, %v380_v16  ;;  %v3178_v19 = vpack.i.bf16 %v3745_v8, %v380_v16  ;;  %s3670_s26 = smov 127   ;;  %s3671_s27 = smov 119  }
  0x1b   : > { %s3672_s28 = smov 118   ;;  %s3673_s29 = smov 117  }
  0x1c   : > { %3139 = vrot.lane.b32.xlu1 %v3760_v12, %s3657_s30  ;;  %s3675_s7 = smov 38   ;;  %s4589_s8 = smov 37  }
  0x1d   : > { %463 = vrot.lane.b32.xlu0 %v3763_v13, %s3657_s30  ;;  %s4595_s9 = smov 29   ;;  %s4591_s10 = smov 28  }
  0x1e   : > { %p365_p8 = scmp.lt.s32.totalorder %s3725_s22, 1 }
  0x20   : > { %3149 = vrot.lane.b32.xlu1 %v3751_v10, %s3658_s11 }
  0x21   : > { %3144 = vrot.lane.b32.xlu0 %v3755_v11, %s3658_s11 }
  0x24   : > { %3164 = vrot.lane.b32.xlu1 %v3163_v17, %s3658_s11 }
  0x25   : > { %3154 = vrot.lane.b32.xlu0 %v3163_v17, %s3657_s30  ;;  %s4597_s30 = smov 39  }
  0x28   : > { %3169 = vrot.lane.b32.xlu1 %v3168_v18, %s3659_s12 }
  0x29   : > { %3159 = vrot.lane.b32.xlu0 %v3168_v18, %s3660_s13 }
  0x2c   : > { %3179 = vrot.lane.b32.xlu1 %v3178_v19, %s3659_s12 }
  0x2d   : > { %3174 = vrot.lane.b32.xlu0 %v3178_v19, %s3660_s13 }
  0x30   : > { %3189 = vrot.lane.b32.xlu1 %v3751_v10, %s3659_s12 }
  0x31   : > { %3184 = vrot.lane.b32.xlu0 %v3751_v10, %s3660_s13 }
  0x34   : > { %3199 = vrot.lane.b32.xlu1 %v3168_v18, %s3661_s14 }
  0x35   : > { %3194 = vrot.lane.b32.xlu0 %v3168_v18, %s3662_s15 }
  0x38   : > { %3209 = vrot.lane.b32.xlu1 %v3178_v19, %s3661_s14 }
  0x39   : > { %3204 = vrot.lane.b32.xlu0 %v3178_v19, %s3662_s15 }
  0x3c   : > { %3219 = vrot.lane.b32.xlu1 %v3751_v10, %s3661_s14 }
  0x3d   : > { %3214 = vrot.lane.b32.xlu0 %v3751_v10, %s3662_s15 }
  0x40   : > { %3229 = vrot.lane.b32.xlu1 %v3168_v18, %s3663_s16 }
  0x41   : > { %3224 = vrot.lane.b32.xlu0 %v3168_v18, %s3664_s17 }
  0x44   : > { %3239 = vrot.lane.b32.xlu1 %v3178_v19, %s3663_s16 }
  0x45   : > { %3234 = vrot.lane.b32.xlu0 %v3178_v19, %s3664_s17 }
  0x48   : > { %3249 = vrot.lane.b32.xlu1 %v3751_v10, %s3663_s16 }
  0x49   : > { %3244 = vrot.lane.b32.xlu0 %v3751_v10, %s3664_s17 }
  0x4c   : > { %3259 = vrot.lane.b32.xlu1 %v3168_v18, %s3665_s18 }
  0x4d   : > { %3254 = vrot.lane.b32.xlu0 %v3168_v18, %s3666_s19 }
  0x50   : > { %3269 = vrot.lane.b32.xlu1 %v3178_v19, %s3665_s18 }
  0x51   : > { %3264 = vrot.lane.b32.xlu0 %v3178_v19, %s3666_s19 }
  0x54   : > { %3279 = vrot.lane.b32.xlu1 %v3751_v10, %s3665_s18 }
  0x55   : > { %3274 = vrot.lane.b32.xlu0 %v3751_v10, %s3666_s19 }
  0x58   : > { %3289 = vrot.lane.b32.xlu1 %v3168_v18, %s3667_s20 }
  0x59   : > { %3284 = vrot.lane.b32.xlu0 %v3168_v18, %s3668_s24 }
  0x5c   : > { %3299 = vrot.lane.b32.xlu1 %v3178_v19, %s3667_s20 }
  0x5d   : > { %3294 = vrot.lane.b32.xlu0 %v3178_v19, %s3668_s24 }
  0x60   : > { %3309 = vrot.lane.b32.xlu1 %v3751_v10, %s3667_s20 }
  0x61   : > { %3304 = vrot.lane.b32.xlu0 %v3751_v10, %s3668_s24 }
  0x64   : > { %3319 = vrot.lane.b32.xlu1 %v3178_v19, %s3669_s25 }
  0x65   : > { %3314 = vrot.lane.b32.xlu0 %v3168_v18, %s3669_s25 }
  0x68   : > { %3329 = vrot.lane.b32.xlu1 %v3755_v11, %s3670_s26 }
  0x69   : > { %3324 = vrot.lane.b32.xlu0 %v3751_v10, %s3669_s25 }
  0x6c   : > { %3339 = vrot.lane.b32.xlu1 %v3827_v20, %s3670_s26 }
  0x6d   : > { %3334 = vrot.lane.b32.xlu0 %v3755_v11, %s3671_s27 }
  0x70   : > { %3349 = vrot.lane.b32.xlu1 %v3348_v21, %s3670_s26 }
  0x71   : > { %3344 = vrot.lane.b32.xlu0 %v3827_v20, %s3671_s27 }
  0x74   : > { %3359 = vrot.lane.b32.xlu1 %v3755_v11, %s3672_s28 }
  0x75   : > { %3354 = vrot.lane.b32.xlu0 %v3348_v21, %s3671_s27 }
  0x78   : > { %3369 = vrot.lane.b32.xlu1 %v3827_v20, %s3672_s28 }
  0x79   : > { %3364 = vrot.lane.b32.xlu0 %v3755_v11, %s3673_s29 }
  0x7c   : > { %3379 = vrot.lane.b32.xlu1 %v3348_v21, %s3672_s28 }
  0x7d   : > { %3374 = vrot.lane.b32.xlu0 %v3827_v20, %s3673_s29 }
  0x80   : > { %3389 = vrot.lane.b32.xlu1 %v3755_v11, %s4597_s30 }
  0x81   : > { %3384 = vrot.lane.b32.xlu0 %v3348_v21, %s3673_s29 }
  0x84   : > { %3399 = vrot.lane.b32.xlu1 %v3827_v20, %s4597_s30 }
  0x85   : > { %3394 = vrot.lane.b32.xlu0 %v3755_v11, %s3675_s7 }
  0x88   : > { %1508 = vrot.lane.b32.xlu1 %v3739_v4, %s4597_s30  ;;  %s3682_s30 = smov 17  }
  0x89   : > { %3404 = vrot.lane.b32.xlu0 %v3827_v20, %s3675_s7 }
  0x8a   : > { %v3861_v22 = vpop.permute.xlu1 %3134 }
  0x8b   : > { %v4614_v23 = vunpack.i.h.bf16 %v3861_v22  ;;  %v3136_v24 = vunpack.i.l.bf16 %v3861_v22  ;;  %v3130_v25 = vpop.permute.xlu0 %3129 }
  0x8c   : > { %3409 = vrot.lane.b32.xlu1 %v3755_v11, %s4589_s8  ;;  %v3132_v29 = vunpack.i.h.bf16 %v3130_v25  ;;  %v3131_v30 = vunpack.i.l.bf16 %v3130_v25 }
  0x8d   : > { %v3870_v26 = vsel %vm465_vm0, %v3136_v24, %v4614_v23  ;;  %1569 = vrot.lane.b32.xlu0 %v3739_v4, %s3675_s7 }
  0x8e   : > { %v3874_v27 = vpop.permute.xlu1 %3139  ;;  %v469_v38 = vsel %vm465_vm0, %v3132_v29, %v3136_v24  ;;  %v468_v41 = vsel %vm465_vm0, %v3131_v30, %v3132_v29 }
  0x8f   : > { %v3876_v28 = vpop.permute.xlu0 %463 }
  0x90   : > { %3419 = vrot.lane.b32.xlu1 %v3827_v20, %s4589_s8 }
  0x91   : > { %3414 = vrot.lane.b32.xlu0 %v3755_v11, %s4595_s9 }
  0x92   : > { %v3882_v31 = vpop.permute.xlu1 %3149 }
  0x93   : > { %v4621_v32 = vunpack.i.h.bf16 %v3882_v31  ;;  %v3151_v33 = vunpack.i.l.bf16 %v3882_v31  ;;  %v3145_v34 = vpop.permute.xlu0 %3144 }
  0x94   : > { %v3147_v35 = vunpack.i.h.bf16 %v3145_v34  ;;  %v3146_v36 = vunpack.i.l.bf16 %v3145_v34  ;;  %1630 = vrot.lane.b32.xlu1 %v3739_v4, %s4589_s8  ;;  %s4593_s8 = smov 27  }
  0x95   : > { %v3891_v37 = vsel %vm526_vm1, %v3151_v33, %v4621_v32  ;;  %3424 = vrot.lane.b32.xlu0 %v3827_v20, %s4595_s9 }
  0x96   : > { %v3165_v39 = vpop.permute.xlu1 %3164  ;;  %v530_v40 = vsel %vm526_vm1, %v3147_v35, %v3151_v33  ;;  %v529_v42 = vsel %vm526_vm1, %v3146_v36, %v3147_v35 }
  0x97   : > { %v3167_v44 = vunpack.i.h.bf16 %v3165_v39  ;;  %v3166_v45 = vunpack.i.l.bf16 %v3165_v39  ;;  %v3155_v46 = vpop.permute.xlu0 %3154  ;;  %v2937_v47 = vpack.c.bf16 %v530_v40, %v469_v38  ;;  %v2939_v48 = vpack.c.bf16 %v529_v42, %v468_v41 }
  0x98   : > { %v3157_v49 = vunpack.i.h.bf16 %v3155_v46  ;;  %v3156_v50 = vunpack.i.l.bf16 %v3155_v46  ;;  %3429 = vrot.lane.b32.xlu1 %v3755_v11, %s4591_s10 }
  0x99   : > { %2938 = vmatprep.subr.bf16.mxu1 %v2937_v47  ;;  %1691 = vrot.lane.b32.xlu0 %v3739_v4, %s4595_s9  ;;  %v528_v51 = vsel %vm526_vm1, %v3167_v44, %v3146_v36  ;;  %v527_v52 = vsel %vm526_vm1, %v3166_v45, %v3167_v44 }
  0x9a   : > { %2940 = vmatpush1.bf16.msra.mxu1 %v2939_v48  ;;  %v3170_v53 = vpop.permute.xlu1 %3169  ;;  %v467_v54 = vsel %vm465_vm0, %v3157_v49, %v3131_v30  ;;  %v466_v55 = vsel %vm465_vm0, %v3156_v50, %v3157_v49 }
  0x9b   : > { %v3172_v56 = vunpack.i.h.bf16 %v3170_v53  ;;  %v3171_v57 = vunpack.i.l.bf16 %v3170_v53  ;;  %v3160_v58 = vpop.permute.xlu0 %3159  ;;  %v2885_v59 = vpack.c.bf16 %v528_v51, %v467_v54  ;;  %v2887_v60 = vpack.c.bf16 %v527_v52, %v466_v55 }
  0x9c   : > { %v3162_v61 = vunpack.i.h.bf16 %v3160_v58  ;;  %v3161_v62 = vunpack.i.l.bf16 %v3160_v58  ;;  %3439 = vrot.lane.b32.xlu1 %v3827_v20, %s4591_s10  ;;  %v3958_v58 = vld.sshfl [vmem:[%s4586_s4] sm:$0x33 pattern:$0x76325410] }
  0x9d   : > { %3434 = vrot.lane.b32.xlu0 %v3755_v11, %s4593_s8  ;;  %2886 = vmatprep.subr.bf16.mxu0 %v2885_v59  ;;  %v650_v63 = vsel %vm648_vm3, %v3171_v57, %v3172_v56 }
  0x9e   : > { %2888 = vmatpush1.bf16.msra.mxu0 %v2887_v60  ;;  %v3180_v0 = vpop.permute.xlu1 %3179  ;;  %v589_v1 = vsel %vm587_vm2, %v3161_v62, %v3162_v61 }
  0x9f   : > { %v3181_v2 = vunpack.i.l.bf16 %v3180_v0  ;;  %v3175_v7 = vpop.permute.xlu0 %3174  ;;  %v2889_v10 = vpack.c.bf16 %v650_v63, %v589_v1  ;;  %v3182_v15 = vunpack.i.h.bf16 %v3180_v0 }
  0xa0   : > { %v3176_v16 = vunpack.i.l.bf16 %v3175_v7  ;;  %1752 = vrot.lane.b32.xlu1 %v3739_v4, %s4591_s10  ;;  %v3177_v17 = vunpack.i.h.bf16 %v3175_v7  ;;  %s3680_s10 = smov 19  }
  0xa1   : > { %3444 = vrot.lane.b32.xlu0 %v3827_v20, %s4593_s8  ;;  %2890 = vmatprep.subr.bf16.mxu0 %v2889_v10  ;;  %v649_v18 = vsel %vm648_vm3, %v3181_v2, %v3171_v57  ;;  %v651_v35 = vsel %vm648_vm3, %v3172_v56, %v3182_v15 }
  0xa2   : > { %v3920_v19 = vpop.permute.xlu1 %3189  ;;  %v588_v21 = vsel %vm587_vm2, %v3176_v16, %v3161_v62  ;;  %v590_v39 = vsel %vm587_vm2, %v3162_v61, %v3177_v17  ;;  %v3964_v61 = vcombine.high %v3958_v58, %v3958_v58 }
  0xa3   : > { %v4612_v24 = vunpack.i.h.bf16 %v3920_v19  ;;  %v3191_v25 = vunpack.i.l.bf16 %v3920_v19  ;;  %v3925_v29 = vpop.permute.xlu0 %3184  ;;  %v2891_v30 = vpack.c.bf16 %v649_v18, %v588_v21  ;;  %v2943_v51 = vpack.c.bf16 %v651_v35, %v590_v39 }
  0xa4   : > { %v4613_v33 = vunpack.i.h.bf16 %v3925_v29  ;;  %v3186_v34 = vunpack.i.l.bf16 %v3925_v29  ;;  %3449 = vrot.lane.b32.xlu1 %v3755_v11, %s3680_s10  ;;  %2875 = vmatprep.mubr.msk.f32.mxu0 %vm2258_vm6, %v3964_v61 }
  0xa5   : > { %v3935_v36 = vsel %vm648_vm3, %v3191_v25, %v4612_v24  ;;  %1813 = vrot.lane.b32.xlu0 %v3739_v4, %s4593_s8  ;;  %2892 = vmatpush1.bf16.msra.mxu0 %v2891_v30  ;;  %v652_v38 = vsel %vm648_vm3, %v3182_v15, %v3191_v25  ;;  %s3681_s8 = smov 18  }
  0xa6   : > { %v3944_v40 = vsel %vm587_vm2, %v3186_v34, %v4613_v33  ;;  %v3200_v41 = vpop.permute.xlu1 %3199  ;;  %v591_v42 = vsel %vm587_vm2, %v3177_v17, %v3186_v34  ;;  %2876 = vmatprep.mubr.msk.f32.mxu1 %vm2258_vm6, %v3964_v61 }
  0xa7   : > { %v3202_v44 = vunpack.i.h.bf16 %v3200_v41  ;;  %v3201_v45 = vunpack.i.l.bf16 %v3200_v41  ;;  %v3195_v46 = vpop.permute.xlu0 %3194  ;;  %v2941_v47 = vpack.c.bf16 %v652_v38, %v591_v42 }
  0xa8   : > { %v3197_v49 = vunpack.i.h.bf16 %v3195_v46  ;;  %v3196_v50 = vunpack.i.l.bf16 %v3195_v46  ;;  %3459 = vrot.lane.b32.xlu1 %v3827_v20, %s3680_s10 }
  0xa9   : > { %3454 = vrot.lane.b32.xlu0 %v3755_v11, %s3681_s8  ;;  %2942 = vmatprep.subr.bf16.mxu1 %v2941_v47  ;;  %v772_v52 = vsel %vm770_vm5, %v3201_v45, %v3202_v44 }
  0xaa   : > { %2944 = vmatpush1.bf16.msra.mxu1 %v2943_v51  ;;  %v3210_v53 = vpop.permute.xlu1 %3209  ;;  %v711_v54 = vsel %vm709_vm4, %v3196_v50, %v3197_v49 }
  0xab   : > { %v3211_v55 = vunpack.i.l.bf16 %v3210_v53  ;;  %v3205_v56 = vpop.permute.xlu0 %3204  ;;  %v2893_v57 = vpack.c.bf16 %v772_v52, %v711_v54  ;;  %v3212_v59 = vunpack.i.h.bf16 %v3210_v53 }
  0xac   : > { %v3206_v60 = vunpack.i.l.bf16 %v3205_v56  ;;  %1874 = vrot.lane.b32.xlu1 %v3739_v4, %s3680_s10  ;;  %v3207_v62 = vunpack.i.h.bf16 %v3205_v56 }
  0xad   : > { %3464 = vrot.lane.b32.xlu0 %v3827_v20, %s3681_s8  ;;  %2894 = vmatprep.subr.bf16.mxu0 %v2893_v57  ;;  %v771_v63 = vsel %vm770_vm5, %v3211_v55, %v3201_v45  ;;  %v773_v18 = vsel %vm770_vm5, %v3202_v44, %v3212_v59 }
  0xae   : > { %v3969_v0 = vpop.permute.xlu1 %3219  ;;  %v710_v1 = vsel %vm709_vm4, %v3206_v60, %v3196_v50  ;;  %v712_v30 = vsel %vm709_vm4, %v3197_v49, %v3207_v62 }
  0xaf   : > { %v4607_v2 = vunpack.i.h.bf16 %v3969_v0  ;;  %v3221_v7 = vunpack.i.l.bf16 %v3969_v0  ;;  %v3978_v10 = vpop.permute.xlu0 %3214  ;;  %v2895_v15 = vpack.c.bf16 %v771_v63, %v710_v1  ;;  %v2947_v49 = vpack.c.bf16 %v773_v18, %v712_v30 }
  0xb0   : > { %v4606_v16 = vunpack.i.h.bf16 %v3978_v10  ;;  %v3216_v17 = vunpack.i.l.bf16 %v3978_v10  ;;  %3469 = vrot.lane.b32.xlu1 %v3760_v12, %s3658_s11 }
  0xb1   : > { %v3988_v21 = vsel %vm770_vm5, %v3221_v7, %v4607_v2  ;;  %1935 = vrot.lane.b32.xlu0 %v3739_v4, %s3681_s8  ;;  %2896 = vmatpush1.bf16.msra.mxu0 %v2895_v15  ;;  %v774_v25 = vsel %vm770_vm5, %v3212_v59, %v3221_v7 }
  0xb2   : > { %v3997_v34 = vsel %vm709_vm4, %v3216_v17, %v4606_v16  ;;  %v3230_v35 = vpop.permute.xlu1 %3229  ;;  %v713_v38 = vsel %vm709_vm4, %v3207_v62, %v3216_v17 }
  0xb3   : > { %v3232_v39 = vunpack.i.h.bf16 %v3230_v35  ;;  %v3231_v41 = vunpack.i.l.bf16 %v3230_v35  ;;  %v3225_v42 = vpop.permute.xlu0 %3224  ;;  %v2945_v44 = vpack.c.bf16 %v774_v25, %v713_v38 }
  0xb4   : > { %v3227_v46 = vunpack.i.h.bf16 %v3225_v42  ;;  %v3226_v47 = vunpack.i.l.bf16 %v3225_v42  ;;  %3479 = vrot.lane.b32.xlu1 %v3827_v20, %s3682_s30 }
  0xb5   : > { %3474 = vrot.lane.b32.xlu0 %v3755_v11, %s3682_s30  ;;  %2946 = vmatprep.subr.bf16.mxu1 %v2945_v44  ;;  %v894_v50 = vsel %vm892_vm8, %v3231_v41, %v3232_v39 }
  0xb6   : > { %2948 = vmatpush1.bf16.msra.mxu1 %v2947_v49  ;;  %v3240_v51 = vpop.permute.xlu1 %3239  ;;  %v833_v52 = vsel %vm831_vm7, %v3226_v47, %v3227_v46 }
  0xb7   : > { %v3241_v53 = vunpack.i.l.bf16 %v3240_v51  ;;  %v3235_v54 = vpop.permute.xlu0 %3234  ;;  %v2897_v55 = vpack.c.bf16 %v894_v50, %v833_v52  ;;  %v3242_v56 = vunpack.i.h.bf16 %v3240_v51 }
  0xb8   : > { %v3236_v57 = vunpack.i.l.bf16 %v3235_v54  ;;  %3484 = vrot.lane.b32.xlu1 %v3760_v12, %s3660_s13  ;;  %v3237_v20 = vunpack.i.h.bf16 %v3235_v54 }
  0xb9   : > { %524 = vrot.lane.b32.xlu0 %v3763_v13, %s3658_s11  ;;  %2898 = vmatprep.subr.bf16.mxu0 %v2897_v55  ;;  %v893_v11 = vsel %vm892_vm8, %v3241_v53, %v3231_v41  ;;  %v895_v18 = vsel %vm892_vm8, %v3232_v39, %v3242_v56  ;;  %s348_s11 = sadd.s32 1, %s3725_s22  ;;  %s4726_s22 = smov (!%p365_p8, %s3725_s22), 1 }
  0xba   : > { %v4013_v59 = vpop.permute.xlu1 %3249  ;;  %v832_v60 = vsel %vm831_vm7, %v3236_v57, %v3226_v47  ;;  %v834_v35 = vsel %vm831_vm7, %v3227_v46, %v3237_v20  ;;  %p349_p6 = scmp.lt.s32.totalorder %s348_s11, 1 }
  0xbb   : > { %v4605_v62 = vunpack.i.h.bf16 %v4013_v59  ;;  %v3251_v63 = vunpack.i.l.bf16 %v4013_v59  ;;  %v4018_v1 = vpop.permute.xlu0 %3244  ;;  %v2899_v7 = vpack.c.bf16 %v893_v11, %v832_v60  ;;  %v2951_v46 = vpack.c.bf16 %v895_v18, %v834_v35 }
  0xbc   : > { %v4604_v15 = vunpack.i.h.bf16 %v4018_v1  ;;  %v3246_v17 = vunpack.i.l.bf16 %v4018_v1  ;;  %1996 = vrot.lane.b32.xlu1 %v3739_v4, %s3682_s30  ;;  %s4722_s11 = smov (!%p349_p6, %s348_s11), 1 }
  0xbd   : > { %v4028_v25 = vsel %vm892_vm8, %v3251_v63, %v4605_v62  ;;  %3489 = vrot.lane.b32.xlu0 %v3760_v12, %s3659_s12  ;;  %2900 = vmatpush1.bf16.msra.mxu0 %v2899_v7  ;;  %v896_v30 = vsel %vm892_vm8, %v3242_v56, %v3251_v63 }
  0xbe   : > { %v4037_v38 = vsel %vm831_vm7, %v3246_v17, %v4604_v15  ;;  %v3260_v41 = vpop.permute.xlu1 %3259  ;;  %v835_v39 = vsel %vm831_vm7, %v3237_v20, %v3246_v17 }
  0xbf   : > { %v3262_v42 = vunpack.i.h.bf16 %v3260_v41  ;;  %v3261_v44 = vunpack.i.l.bf16 %v3260_v41  ;;  %v3255_v47 = vpop.permute.xlu0 %3254  ;;  %v2949_v49 = vpack.c.bf16 %v896_v30, %v835_v39 }
  0xc0   : > { %v3257_v51 = vunpack.i.h.bf16 %v3255_v47  ;;  %v3256_v52 = vunpack.i.l.bf16 %v3255_v47  ;;  %646 = vrot.lane.b32.xlu1 %v3763_v13, %s3659_s12  ;;  %s2870_s12 = sshll.u32 %s4722_s11, 3 }
  0xc1   : > { %585 = vrot.lane.b32.xlu0 %v3763_v13, %s3660_s13  ;;  %2950 = vmatprep.subr.bf16.mxu1 %v2949_v49  ;;  %v1016_v53 = vsel %vm1014_vm10, %v3261_v44, %v3262_v42  ;;  %p4126_p7 = scmp.lt.s32.totalorder %s2870_s12, 15 }
  0xc2   : > { %2952 = vmatpush1.bf16.msra.mxu1 %v2951_v46  ;;  %v3270_v54 = vpop.permute.xlu1 %3269  ;;  %v955_v55 = vsel %vm953_vm9, %v3256_v52, %v3257_v51 }
  0xc3   : > { %v3271_v56 = vunpack.i.l.bf16 %v3270_v54  ;;  %v3265_v57 = vpop.permute.xlu0 %3264  ;;  %v2901_v20 = vpack.c.bf16 %v1016_v53, %v955_v55  ;;  %v3272_v11 = vunpack.i.h.bf16 %v3270_v54  ;;  %s4724_s12 = smov (!%p4126_p7, %s2870_s12), 15 }
  0xc4   : > { %v3266_v60 = vunpack.i.l.bf16 %v3265_v57  ;;  %3499 = vrot.lane.b32.xlu1 %v3760_v12, %s3661_s14  ;;  %v3267_v63 = vunpack.i.h.bf16 %v3265_v57 }
  0xc5   : > { %3494 = vrot.lane.b32.xlu0 %v3760_v12, %s3662_s15  ;;  %2902 = vmatprep.subr.bf16.mxu0 %v2901_v20  ;;  %v1015_v7 = vsel %vm1014_vm10, %v3271_v56, %v3261_v44  ;;  %v1017_v44 = vsel %vm1014_vm10, %v3262_v42, %v3272_v11 }
  0xc6   : > { %v4053_v17 = vpop.permute.xlu1 %3279  ;;  %v954_v18 = vsel %vm953_vm9, %v3266_v60, %v3256_v52  ;;  %v956_v53 = vsel %vm953_vm9, %v3257_v51, %v3267_v63 }
  0xc7   : > { %v4601_v30 = vunpack.i.h.bf16 %v4053_v17  ;;  %v3281_v35 = vunpack.i.l.bf16 %v4053_v17  ;;  %v4058_v41 = vpop.permute.xlu0 %3274  ;;  %v2903_v39 = vpack.c.bf16 %v1015_v7, %v954_v18  ;;  %v2955_v18 = vpack.c.bf16 %v1017_v44, %v956_v53 }
  0xc8   : > { %v4599_v47 = vunpack.i.h.bf16 %v4058_v41  ;;  %v3276_v49 = vunpack.i.l.bf16 %v4058_v41  ;;  %768 = vrot.lane.b32.xlu1 %v3763_v13, %s3661_s14  ;;  %s2871_s14 = sshll.u32 %s4724_s12, 2 }
  0xc9   : > { %v4068_v52 = vsel %vm1014_vm10, %v3281_v35, %v4601_v30  ;;  %707 = vrot.lane.b32.xlu0 %v3763_v13, %s3662_s15  ;;  %2904 = vmatpush1.bf16.msra.mxu0 %v2903_v39  ;;  %v1018_v46 = vsel %vm1014_vm10, %v3272_v11, %v3281_v35 }
  0xca   : > { %v4078_v54 = vsel %vm953_vm9, %v3276_v49, %v4599_v47  ;;  %v3290_v42 = vpop.permute.xlu1 %3289  ;;  %v957_v55 = vsel %vm953_vm9, %v3267_v63, %v3276_v49 }
  0xcb   : > { %v3292_v56 = vunpack.i.h.bf16 %v3290_v42  ;;  %v3291_v57 = vunpack.i.l.bf16 %v3290_v42  ;;  %v3285_v20 = vpop.permute.xlu0 %3284  ;;  %v2953_v60 = vpack.c.bf16 %v1018_v46, %v957_v55 }
  0xcc   : > { %v3287_v7 = vunpack.i.h.bf16 %v3285_v20  ;;  %v3286_v51 = vunpack.i.l.bf16 %v3285_v20  ;;  %3509 = vrot.lane.b32.xlu1 %v3760_v12, %s3663_s16 }
  0xcd   : > { %3504 = vrot.lane.b32.xlu0 %v3760_v12, %s3664_s17  ;;  %2954 = vmatprep.subr.bf16.mxu1 %v2953_v60  ;;  %v1138_v63 = vsel %vm1136_vm12, %v3291_v57, %v3292_v56 }
  0xce   : > { %2956 = vmatpush1.bf16.msra.mxu1 %v2955_v18  ;;  %v3300_v35 = vpop.permute.xlu1 %3299  ;;  %v1077_v39 = vsel %vm4610_vm11, %v3286_v51, %v3287_v7 }
  0xcf   : > { %v3301_v49 = vunpack.i.l.bf16 %v3300_v35  ;;  %v3295_v46 = vpop.permute.xlu0 %3294  ;;  %v2905_v42 = vpack.c.bf16 %v1138_v63, %v1077_v39  ;;  %v3302_v55 = vunpack.i.h.bf16 %v3300_v35 }
  0xd0   : > { %v3296_v20 = vunpack.i.l.bf16 %v3295_v46  ;;  %890 = vrot.lane.b32.xlu1 %v3763_v13, %s3663_s16  ;;  %v3297_v44 = vunpack.i.h.bf16 %v3295_v46 }
  0xd1   : > { %829 = vrot.lane.b32.xlu0 %v3763_v13, %s3664_s17  ;;  %2906 = vmatprep.subr.bf16.mxu0 %v2905_v42  ;;  %v1137_v53 = vsel %vm1136_vm12, %v3301_v49, %v3291_v57  ;;  %v1139_v57 = vsel %vm1136_vm12, %v3292_v56, %v3302_v55  ;;  %s355_s17 = scalar_lea.vmem %s4585_s3, %s2871_s14 }
  0xd2   : > { %v4096_v60 = vpop.permute.xlu1 %3309  ;;  %v1076_v18 = vsel %vm4610_vm11, %v3296_v20, %v3286_v51  ;;  %v1078_v42 = vsel %vm4610_vm11, %v3287_v7, %v3297_v44 }
  0xd3   : > { %v4600_v63 = vunpack.i.h.bf16 %v4096_v60  ;;  %v3311_v35 = vunpack.i.l.bf16 %v4096_v60  ;;  %v4101_v39 = vpop.permute.xlu0 %3304  ;;  %v2907_v11 = vpack.c.bf16 %v1137_v53, %v1076_v18 }
  0xd4   : > { %v4603_v47 = vunpack.i.h.bf16 %v4101_v39  ;;  %v3306_v46 = vunpack.i.l.bf16 %v4101_v39  ;;  %3519 = vrot.lane.b32.xlu1 %v3760_v12, %s3665_s18 }
  0xd5   : > { %v4112_v51 = vsel %vm1136_vm12, %v3311_v35, %v4600_v63  ;;  %3514 = vrot.lane.b32.xlu0 %v3760_v12, %s3666_s19  ;;  %2908 = vmatpush1.bf16.msra.mxu0 %v2907_v11  ;;  %v1140_v49 = vsel %vm1136_vm12, %v3302_v55, %v3311_v35  ;;  %v2959_v55 = vpack.c.bf16 %v1139_v57, %v1078_v42 }
  0xd6   : > { %v4121_v20 = vsel %vm4610_vm11, %v3306_v46, %v4603_v47  ;;  %v3320_v56 = vpop.permute.xlu1 %3319  ;;  %v1079_v53 = vsel %vm4610_vm11, %v3297_v44, %v3306_v46  ;;  %v409_v47 = vld [vmem:[%s355_s17] sm:$0xf]  ;;  %vm4620_vm11 = vcmask 957440  }
  0xd7   : > { %v3321_v63 = vunpack.i.l.bf16 %v3320_v56  ;;  %v3315_v30 = vpop.permute.xlu0 %3314  ;;  %v2957_v50 = vpack.c.bf16 %v1140_v49, %v1079_v53  ;;  %v3322_v35 = vunpack.i.h.bf16 %v3320_v56 }
  0xd8   : > { %v3317_v11 = vunpack.i.h.bf16 %v3315_v30  ;;  %v3316_v7 = vunpack.i.l.bf16 %v3315_v30  ;;  %1012 = vrot.lane.b32.xlu1 %v3763_v13, %s3665_s18  ;;  %s4634_s18 = smov 39  }
  0xd9   : > { %951 = vrot.lane.b32.xlu0 %v3763_v13, %s3666_s19  ;;  %2958 = vmatprep.subr.bf16.mxu1 %v2957_v50  ;;  %s4637_s19 = smov 29  }
  0xda   : > { %2960 = vmatpush1.bf16.msra.mxu1 %v2959_v55  ;;  %v4134_v44 = vpop.permute.xlu1 %3329  ;;  %v1199_v46 = vsel %vm4609_vm13, %v3316_v7, %v3317_v11  ;;  %v1198_v49 = vsel %vm4609_vm13, %v3321_v63, %v3316_v7  ;;  %v1200_v63 = vsel %vm4609_vm13, %v3317_v11, %v3322_v35 }
  0xdb   : > { %v4138_v53 = vpop.permute.xlu0 %3324  ;;  %v2909_v30 = vpack.c.bf16 %v3743_v6, %v1199_v46  ;;  %v2911_v18 = vpack.c.bf16 %v3768_v14, %v1198_v49  ;;  %v3332_v6 = vunpack.i.h.bf16 %v4134_v44  ;;  %v3331_v14 = vunpack.i.l.bf16 %v4134_v44 }
  0xdc   : > { %v4602_v57 = vunpack.i.h.bf16 %v4138_v53  ;;  %v3326_v50 = vunpack.i.l.bf16 %v4138_v53  ;;  %3529 = vrot.lane.b32.xlu1 %v3760_v12, %s3667_s20  ;;  %v2963_v44 = vpack.c.bf16 %v3745_v8, %v1200_v63 }
  0xdd   : > { %3524 = vrot.lane.b32.xlu0 %v3760_v12, %s3668_s24  ;;  %2910 = vmatprep.subr.bf16.mxu0 %v2909_v30 }
  0xde   : > { %v4158_v42 = vsel %vm4609_vm13, %v3326_v50, %v4602_v57  ;;  %2912 = vmatpush1.bf16.msra.mxu0 %v2911_v18  ;;  %v3340_v56 = vpop.permute.xlu1 %3339  ;;  %v1201_v7 = vsel %vm4609_vm13, %v3322_v35, %v3326_v50  ;;  %vm4619_vm13 = vcmask 965632  }
  0xdf   : > { %v3335_v55 = vpop.permute.xlu0 %3334  ;;  %v2961_v46 = vpack.c.bf16 %v3737_v3, %v1201_v7  ;;  %v3341_v18 = vunpack.i.l.bf16 %v3340_v56  ;;  %v1276_v3 = vsel %vm4615_vm14, %v3331_v14, %v3332_v6  ;;  %v3342_v62 = vunpack.i.h.bf16 %v3340_v56 }
  0xe0   : > { %v3337_v11 = vunpack.i.h.bf16 %v3335_v55  ;;  %v3336_v49 = vunpack.i.l.bf16 %v3335_v55  ;;  %1134 = vrot.lane.b32.xlu1 %v3763_v13, %s3667_s20  ;;  %s4638_s20 = smov 37  }
  0xe1   : > { %1073 = vrot.lane.b32.xlu0 %v3763_v13, %s3668_s24  ;;  %2962 = vmatprep.subr.bf16.mxu1 %v2961_v46  ;;  %v3543_v46 = vpack.i.bf16 %v3763_v13, %v3747_v9  ;;  %s4640_s24 = smov 27  }
  0xe2   : > { %2964 = vmatpush1.bf16.msra.mxu1 %v2963_v44  ;;  %v4168_v35 = vpop.permute.xlu1 %3349  ;;  %v1337_v30 = vsel %vm4616_vm15, %v3336_v49, %v3337_v11 }
  0xe3   : > { %v4608_v50 = vunpack.i.h.bf16 %v4168_v35  ;;  %v3351_v8 = vunpack.i.l.bf16 %v4168_v35  ;;  %v3345_v63 = vpop.permute.xlu0 %3344  ;;  %v2913_v7 = vpack.c.bf16 %v1337_v30, %v1276_v3  ;;  %v1275_v3 = vsel %vm4615_vm14, %v3341_v18, %v3331_v14 }
  0xe4   : > { %v3346_v55 = vunpack.i.l.bf16 %v3345_v63  ;;  %1195 = vrot.lane.b32.xlu1 %v3763_v13, %s3669_s25  ;;  %v3347_v57 = vunpack.i.h.bf16 %v3345_v63  ;;  %v4197_v63 = vunpack.c.l.bf16 %v409_v47 }
  0xe5   : > { %v4184_v44 = vsel %vm4615_vm14, %v3351_v8, %v4608_v50  ;;  %3534 = vrot.lane.b32.xlu0 %v3760_v12, %s3669_s25  ;;  %2914 = vmatprep.subr.bf16.mxu0 %v2913_v7  ;;  %v1278_v7 = vsel %vm4615_vm14, %v3342_v62, %v3351_v8  ;;  %s4641_s25 = smov 28  }
  0xe6   : > { %v4188_v15 = vpop.permute.xlu1 %3359  ;;  %v1336_v30 = vsel %vm4616_vm15, %v3346_v55, %v3336_v49  ;;  %v1338_v14 = vsel %vm4616_vm15, %v3337_v11, %v3347_v57  ;;  %v1277_v11 = vsel %vm4615_vm14, %v3332_v6, %v3342_v62  ;;  %vm4623_vm14 = vcmask 318464  }
  0xe7   : > { %v4192_v45 = vpop.permute.xlu0 %3354  ;;  %v2915_v16 = vpack.c.bf16 %v1336_v30, %v1275_v3  ;;  %v3362_v56 = vunpack.i.h.bf16 %v4188_v15  ;;  %v3361_v49 = vunpack.i.l.bf16 %v4188_v15  ;;  %v2967_v15 = vpack.c.bf16 %v1338_v14, %v1277_v11 }
  0xe8   : > { %v4611_v2 = vunpack.i.h.bf16 %v4192_v45  ;;  %v3356_v50 = vunpack.i.l.bf16 %v4192_v45  ;;  %3544 = vrot.lane.b32.xlu1 %v3543_v46, %s3671_s27 }
  0xe9   : > { %3539 = vrot.lane.b32.xlu0 %v3543_v46, %s3670_s26  ;;  %2916 = vmatpush1.bf16.msra.mxu0 %v2915_v16 }
  0xea   : > { %v4207_v18 = vsel %vm4616_vm15, %v3356_v50, %v4611_v2  ;;  %v3370_v55 = vpop.permute.xlu1 %3369  ;;  %v1339_v47 = vsel %vm4616_vm15, %v3347_v57, %v3356_v50  ;;  %v1398_v50 = vsel %vm4619_vm13, %v3361_v49, %v3362_v56  ;;  %vm4624_vm15 = vcmask 310272  }
  0xeb   : > { %v3365_v3 = vpop.permute.xlu0 %3364  ;;  %v2965_v8 = vpack.c.bf16 %v1339_v47, %v1278_v7  ;;  %v3371_v2 = vunpack.i.l.bf16 %v3370_v55  ;;  %v3372_v33 = vunpack.i.h.bf16 %v3370_v55 }
  0xec   : > { %v3367_v30 = vunpack.i.h.bf16 %v3365_v3  ;;  %v3366_v48 = vunpack.i.l.bf16 %v3365_v3  ;;  %1333 = vrot.lane.b32.xlu1 %v4197_v63, %s3671_s27 }
  0xed   : > { %1272 = vrot.lane.b32.xlu0 %v4197_v63, %s3670_s26  ;;  %2966 = vmatprep.subr.bf16.mxu1 %v2965_v8 }
  0xee   : > { %2968 = vmatpush1.bf16.msra.mxu1 %v2967_v15  ;;  %v4217_v57 = vpop.permute.xlu1 %3379  ;;  %v1459_v7 = vsel %vm4620_vm11, %v3366_v48, %v3367_v30  ;;  %v1397_v15 = vsel %vm4619_vm13, %v3371_v2, %v3361_v49 }
  0xef   : > { %v4617_v62 = vunpack.i.h.bf16 %v4217_v57  ;;  %v3381_v6 = vunpack.i.l.bf16 %v4217_v57  ;;  %v3375_v47 = vpop.permute.xlu0 %3374  ;;  %v2917_v3 = vpack.c.bf16 %v1459_v7, %v1398_v50 }
  0xf0   : > { %v3376_v16 = vunpack.i.l.bf16 %v3375_v47  ;;  %3554 = vrot.lane.b32.xlu1 %v3543_v46, %s3673_s29  ;;  %v3377_v8 = vunpack.i.h.bf16 %v3375_v47 }
  0xf1   : > { %v4227_v14 = vsel %vm4619_vm13, %v3381_v6, %v4617_v62  ;;  %3549 = vrot.lane.b32.xlu0 %v3543_v46, %s3672_s28  ;;  %2918 = vmatprep.subr.bf16.mxu0 %v2917_v3  ;;  %v1400_v46 = vsel %vm4619_vm13, %v3372_v33, %v3381_v6  ;;  %v1399_v6 = vsel %vm4619_vm13, %v3362_v56, %v3372_v33  ;;  %vm4627_vm13 = vcmask 302080  }
  0xf2   : > { %v3390_v11 = vpop.permute.xlu1 %3389  ;;  %v1458_v24 = vsel %vm4620_vm11, %v3376_v16, %v3366_v48  ;;  %v1460_v2 = vsel %vm4620_vm11, %v3367_v30, %v3377_v8  ;;  %v4255_v62 = vpack.i.bf16 %v4197_v63, %v3763_v13 }
  0xf3   : > { %v4232_v43 = vpop.permute.xlu0 %3384  ;;  %v2919_v50 = vpack.c.bf16 %v1458_v24, %v1397_v15  ;;  %v3392_v48 = vunpack.i.h.bf16 %v3390_v11  ;;  %v3391_v49 = vunpack.i.l.bf16 %v3390_v11  ;;  %v2971_v11 = vpack.c.bf16 %v1460_v2, %v1399_v6 }
  0xf4   : > { %v4618_v7 = vunpack.i.h.bf16 %v4232_v43  ;;  %v3386_v23 = vunpack.i.l.bf16 %v4232_v43  ;;  %1455 = vrot.lane.b32.xlu1 %v4197_v63, %s3673_s29 }
  0xf5   : > { %1394 = vrot.lane.b32.xlu0 %v4197_v63, %s3672_s28  ;;  %2920 = vmatpush1.bf16.msra.mxu0 %v2919_v50  ;;  %v1520_v33 = vsel %vm4623_vm14, %v3391_v49, %v3392_v48 }
  0xf6   : > { %v4245_v24 = vsel %vm4620_vm11, %v3386_v23, %v4618_v7  ;;  %v3400_v55 = vpop.permute.xlu1 %3399  ;;  %v1461_v16 = vsel %vm4620_vm11, %v3377_v8, %v3386_v23  ;;  %vm4628_vm11 = vcmask 236544  }
  0xf7   : > { %v3395_v3 = vpop.permute.xlu0 %3394  ;;  %v2969_v15 = vpack.c.bf16 %v1461_v16, %v1400_v46  ;;  %v3401_v23 = vunpack.i.l.bf16 %v3400_v55  ;;  %v3402_v63 = vunpack.i.h.bf16 %v3400_v55 }
  0xf8   : > { %v3397_v30 = vunpack.i.h.bf16 %v3395_v3  ;;  %v3396_v50 = vunpack.i.l.bf16 %v3395_v3  ;;  %3564 = vrot.lane.b32.xlu1 %v3760_v12, %s3675_s7 }
  0xf9   : > { %3559 = vrot.lane.b32.xlu0 %v3760_v12, %s4634_s18  ;;  %2970 = vmatprep.subr.bf16.mxu1 %v2969_v15  ;;  %v1519_v6 = vsel %vm4623_vm14, %v3401_v23, %v3391_v49  ;;  %v1521_v49 = vsel %vm4623_vm14, %v3392_v48, %v3402_v63 }
  0xfa   : > { %2972 = vmatpush1.bf16.msra.mxu1 %v2971_v11  ;;  %v4259_v8 = vpop.permute.xlu1 %1508  ;;  %v1581_v56 = vsel %vm4624_vm15, %v3396_v50, %v3397_v30 }
  0xfb   : > { %4635 = vst [vmem:[#allocation4_spill] sm:$0xff] %v4259_v8  ;;  %v3405_v46 = vpop.permute.xlu0 %3404  ;;  %v2921_v16 = vpack.c.bf16 %v1581_v56, %v1520_v33  ;;  %v1522_v56 = vsel %vm4623_vm14, %v3402_v63, %v4259_v8  ;;  %vm4632_vm14 = vcmask 228352  }
  0xfc   : > { %v3407_v3 = vunpack.i.h.bf16 %v3405_v46  ;;  %v3406_v2 = vunpack.i.l.bf16 %v3405_v46  ;;  %3574 = vrot.lane.b32.xlu1 %v4255_v62, %s3675_s7  ;;  %s328_s7 = scalar_lea.vmem %s4582_s0, %s4716_s23 }
  0xfd   : > { %3569 = vrot.lane.b32.xlu0 %v4255_v62, %s4634_s18  ;;  %2922 = vmatprep.subr.bf16.mxu0 %v2921_v16 }
  0xfe   : > { %v3410_v15 = vpop.permute.xlu1 %3409  ;;  %v1580_v11 = vsel %vm4624_vm15, %v3406_v2, %v3396_v50  ;;  %v1582_v33 = vsel %vm4624_vm15, %v3397_v30, %v3407_v3 }
  0xff   : > { %v4269_v47 = vpop.permute.xlu0 %1569  ;;  %v2923_v7 = vpack.c.bf16 %v1580_v11, %v1519_v6  ;;  %v3412_v50 = vunpack.i.h.bf16 %v3410_v15  ;;  %v3411_v23 = vunpack.i.l.bf16 %v3410_v15  ;;  %v2975_v30 = vpack.c.bf16 %v1582_v33, %v1521_v49 }
 0x100   : > { %4636 = vst [vmem:[#allocation5_spill] sm:$0xff] %v4269_v47  ;;  %v1583_v55 = vsel %vm4624_vm15, %v3407_v3, %v4269_v47  ;;  %3584 = vrot.lane.b32.xlu1 %v3760_v12, %s4637_s19  ;;  %vm1823_vm15 = vcmask 220160  }
 0x101   : > { %v2973_v46 = vpack.c.bf16 %v1583_v55, %v1522_v56  ;;  %3579 = vrot.lane.b32.xlu0 %v3760_v12, %s4638_s20  ;;  %2924 = vmatpush1.bf16.msra.mxu0 %v2923_v7  ;;  %v1642_v48 = vsel %vm4627_vm13, %v3411_v23, %v3412_v50 }
 0x102   : > { %v3420_v16 = vpop.permute.xlu1 %3419 }
 0x103   : > { %v3415_v2 = vpop.permute.xlu0 %3414  ;;  %2974 = vmatprep.subr.bf16.mxu1 %v2973_v46  ;;  %v3421_v7 = vunpack.i.l.bf16 %v3420_v16  ;;  %v3422_v46 = vunpack.i.h.bf16 %v3420_v16 }
 0x104   : > { %v3417_v6 = vunpack.i.h.bf16 %v3415_v2  ;;  %v3416_v3 = vunpack.i.l.bf16 %v3415_v2  ;;  %2976 = vmatpush1.bf16.msra.mxu1 %v2975_v30  ;;  %3594 = vrot.lane.b32.xlu1 %v4255_v62, %s4637_s19 }
 0x105   : > { %3589 = vrot.lane.b32.xlu0 %v4255_v62, %s4638_s20  ;;  %v1641_v30 = vsel %vm4627_vm13, %v3421_v7, %v3411_v23  ;;  %v1643_v23 = vsel %vm4627_vm13, %v3412_v50, %v3422_v46 }
 0x106   : > { %v4285_v11 = vpop.permute.xlu1 %1630  ;;  %v1703_v63 = vsel %vm4628_vm11, %v3416_v3, %v3417_v6 }
 0x107   : > { %4639 = vst [vmem:[#allocation6_spill] sm:$0xff] %v4285_v11  ;;  %v3425_v15 = vpop.permute.xlu0 %3424  ;;  %v2925_v33 = vpack.c.bf16 %v1703_v63, %v1642_v48  ;;  %v1644_v63 = vsel %vm4627_vm13, %v3422_v46, %v4285_v11  ;;  %vm1884_vm13 = vcmask 154624  }
 0x108   : > { %v3427_v56 = vunpack.i.h.bf16 %v3425_v15  ;;  %v3426_v55 = vunpack.i.l.bf16 %v3425_v15  ;;  %3604 = vrot.lane.b32.xlu1 %v3760_v12, %s4640_s24 }
 0x109   : > { %3599 = vrot.lane.b32.xlu0 %v3760_v12, %s4641_s25  ;;  %2926 = vmatprep.subr.bf16.mxu0 %v2925_v33 }
 0x10a   : > { %v3430_v49 = vpop.permute.xlu1 %3429  ;;  %v1702_v2 = vsel %vm4628_vm11, %v3426_v55, %v3416_v3  ;;  %v1704_v48 = vsel %vm4628_vm11, %v3417_v6, %v3427_v56 }
 0x10b   : > { %v4295_v32 = vpop.permute.xlu0 %1691  ;;  %v2927_v8 = vpack.c.bf16 %v1702_v2, %v1641_v30  ;;  %v3432_v3 = vunpack.i.h.bf16 %v3430_v49  ;;  %v3431_v7 = vunpack.i.l.bf16 %v3430_v49  ;;  %v2979_v6 = vpack.c.bf16 %v1704_v48, %v1643_v23 }
 0x10c   : > { %4642 = vst [vmem:[#allocation7_spill] sm:$0xff] %v4295_v32  ;;  %v1705_v16 = vsel %vm4628_vm11, %v3427_v56, %v4295_v32  ;;  %3614 = vrot.lane.b32.xlu1 %v4255_v62, %s4640_s24  ;;  %vm1945_vm11 = vcmask 146432  }
 0x10d   : > { %v2977_v15 = vpack.c.bf16 %v1705_v16, %v1644_v63  ;;  %3609 = vrot.lane.b32.xlu0 %v4255_v62, %s4641_s25  ;;  %2928 = vmatpush1.bf16.msra.mxu0 %v2927_v8  ;;  %v1764_v50 = vsel %vm4632_vm14, %v3431_v7, %v3432_v3 }
 0x10e   : > { %v3440_v33 = vpop.permute.xlu1 %3439 }
 0x10f   : > { %v3435_v55 = vpop.permute.xlu0 %3434  ;;  %2978 = vmatprep.subr.bf16.mxu1 %v2977_v15  ;;  %v3441_v8 = vunpack.i.l.bf16 %v3440_v33  ;;  %v3442_v15 = vunpack.i.h.bf16 %v3440_v33 }
 0x110   : > { %v3437_v30 = vunpack.i.h.bf16 %v3435_v55  ;;  %v3436_v56 = vunpack.i.l.bf16 %v3435_v55  ;;  %2980 = vmatpush1.bf16.msra.mxu1 %v2979_v6  ;;  %3624 = vrot.lane.b32.xlu1 %v3760_v12, %s3681_s8 }
 0x111   : > { %3619 = vrot.lane.b32.xlu0 %v3760_v12, %s3680_s10  ;;  %v1763_v6 = vsel %vm4632_vm14, %v3441_v8, %v3431_v7  ;;  %v1765_v7 = vsel %vm4632_vm14, %v3432_v3, %v3442_v15 }
 0x112   : > { %v4311_v2 = vpop.permute.xlu1 %1752  ;;  %v1825_v46 = vsel %vm1823_vm15, %v3436_v56, %v3437_v30 }
 0x113   : > { %4643 = vst [vmem:[#allocation8_spill] sm:$0xff] %v4311_v2  ;;  %v3445_v49 = vpop.permute.xlu0 %3444  ;;  %v2929_v48 = vpack.c.bf16 %v1825_v46, %v1764_v50  ;;  %v1766_v46 = vsel %vm4632_vm14, %v3442_v15, %v4311_v2  ;;  %vm2006_vm14 = vcmask 138240  }
 0x114   : > { %v3447_v63 = vunpack.i.h.bf16 %v3445_v49  ;;  %v3446_v16 = vunpack.i.l.bf16 %v3445_v49  ;;  %3634 = vrot.lane.b32.xlu1 %v4255_v62, %s3681_s8 }
 0x115   : > { %3629 = vrot.lane.b32.xlu0 %v4255_v62, %s3680_s10  ;;  %2930 = vmatprep.subr.bf16.mxu0 %v2929_v48  ;;  %s363_s10 = scalar_lea.vmem %s4587_s5, %s4716_s23 }
 0x116   : > { %v3450_v23 = vpop.permute.xlu1 %3449  ;;  %v1824_v55 = vsel %vm1823_vm15, %v3446_v16, %v3436_v56  ;;  %v1826_v50 = vsel %vm1823_vm15, %v3437_v30, %v3447_v63 }
 0x117   : > { %v4321_v11 = vpop.permute.xlu0 %1813  ;;  %v2931_v32 = vpack.c.bf16 %v1824_v55, %v1763_v6  ;;  %v3452_v56 = vunpack.i.h.bf16 %v3450_v23  ;;  %v3451_v8 = vunpack.i.l.bf16 %v3450_v23  ;;  %v2983_v30 = vpack.c.bf16 %v1826_v50, %v1765_v7 }
 0x118   : > { %4644 = vst [vmem:[#allocation9_spill] sm:$0xff] %v4321_v11  ;;  %v1827_v33 = vsel %vm1823_vm15, %v3447_v63, %v4321_v11  ;;  %3644 = vrot.lane.b32.xlu1 %v4255_v62, %s3682_s30 }
 0x119   : > { %v2981_v49 = vpack.c.bf16 %v1827_v33, %v1766_v46  ;;  %3639 = vrot.lane.b32.xlu0 %v3760_v12, %s3682_s30  ;;  %2932 = vmatpush1.bf16.msra.mxu0 %v2931_v32  ;;  %v1886_v46 = vsel %vm1884_vm13, %v3451_v8, %v3452_v56  ;;  %s2873_s30 = sshll.u32 %s4726_s22, 1 }
 0x11a   : > { %v3460_v48 = vpop.permute.xlu1 %3459  ;;  %s368_s13 = scalar_lea.vmem %s4588_s6, %s2873_s30 }
 0x11b   : > { %v3455_v16 = vpop.permute.xlu0 %3454  ;;  %2982 = vmatprep.subr.bf16.mxu1 %v2981_v49  ;;  %v3461_v55 = vunpack.i.l.bf16 %v3460_v48  ;;  %v3462_v33 = vunpack.i.h.bf16 %v3460_v48 }
 0x11c   : > { %v3457_v6 = vunpack.i.h.bf16 %v3455_v16  ;;  %v3456_v63 = vunpack.i.l.bf16 %v3455_v16  ;;  %2984 = vmatpush1.bf16.msra.mxu1 %v2983_v30 }
 0x11d   : > { %v1885_v49 = vsel %vm1884_vm13, %v3461_v55, %v3451_v8  ;;  %v1887_v48 = vsel %vm1884_vm13, %v3452_v56, %v3462_v33  ;;  %v3141_v8 = vunpack.i.l.bf16 %v3874_v27 }
 0x11e   : > { %v4333_v62 = vpop.permute.xlu1 %1874  ;;  %v1947_v12 = vsel %vm1945_vm11, %v3456_v63, %v3457_v6 }
 0x11f   : > { %v3465_v32 = vpop.permute.xlu0 %3464  ;;  %v2933_v3 = vpack.c.bf16 %v1947_v12, %v1886_v46  ;;  %v1888_v11 = vsel %vm1884_vm13, %v3462_v33, %v4333_v62  ;;  %v4646_v33 = vunpack.i.h.bf16 %v3861_v22  ;;  %v4647_v22 = vpack.c.bf16 %v3891_v37, %v3870_v26 }
 0x120   : > { %v3467_v15 = vunpack.i.h.bf16 %v3465_v32  ;;  %v3466_v23 = vunpack.i.l.bf16 %v3465_v32 }
 0x121   : > { %2934 = vmatprep.subr.bf16.mxu0 %v2933_v3 }
 0x122   : > { %v3470_v50 = vpop.permute.xlu1 %3469  ;;  %v1946_v7 = vsel %vm1945_vm11, %v3466_v23, %v3456_v63  ;;  %v1948_v2 = vsel %vm1945_vm11, %v3457_v6, %v3467_v15 }
 0x123   : > { %v4339_v16 = vpop.permute.xlu0 %1935  ;;  %v2935_v30 = vpack.c.bf16 %v1946_v7, %v1885_v49  ;;  %v3471_v47 = vunpack.i.l.bf16 %v3470_v50  ;;  %v2987_v63 = vpack.c.bf16 %v1948_v2, %v1887_v48  ;;  %v4645_v49 = vunpack.i.h.bf16 %v3882_v31 }
 0x124   : > { %v1949_v46 = vsel %vm1945_vm11, %v3467_v15, %v4339_v16  ;;  %v3472_v15 = vunpack.i.h.bf16 %v3470_v50  ;;  %v471_v2 = vsel %vm465_vm0, %v4646_v33, %v3141_v8  ;;  %v4649_v33 = vunpack.i.h.bf16 %v3920_v19 }
 0x125   : > { %v2985_v12 = vpack.c.bf16 %v1949_v46, %v1888_v11  ;;  %2936 = vmatpush1.bf16.msra.mxu0 %v2935_v30  ;;  %v532_v7 = vsel %vm526_vm1, %v4645_v49, %v3471_v47  ;;  %v3142_v46 = vunpack.i.h.bf16 %v3874_v27  ;;  %v4650_v19 = vpack.c.bf16 %v3935_v36, %v3944_v40 }
 0x126   : > { %v3480_v55 = vpop.permute.xlu1 %3479  ;;  %v2989_v48 = vpack.c.bf16 %v532_v7, %v471_v2  ;;  %v533_v50 = vsel %vm526_vm1, %v3471_v47, %v3472_v15 }
 0x127   : > { %v3481_v32 = vunpack.i.l.bf16 %v3480_v55  ;;  %v3475_v3 = vpop.permute.xlu0 %3474  ;;  %2986 = vmatprep.subr.bf16.mxu1 %v2985_v12  ;;  %v472_v27 = vsel %vm465_vm0, %v3141_v8, %v3142_v46  ;;  %v4376_v8 = vld.sshfl [vmem:[%s4586_s4] sm:$0x33 pattern:$0x76325410] }
 0x128   : > { %v3477_v6 = vunpack.i.h.bf16 %v3475_v3  ;;  %v3476_v23 = vunpack.i.l.bf16 %v3475_v3  ;;  %2988 = vmatpush1.bf16.msra.mxu1 %v2987_v63  ;;  %v3482_v63 = vunpack.i.h.bf16 %v3480_v55  ;;  %v473_v55 = vsel %vm465_vm0, %v3142_v46, %v3876_v28 }
 0x129   : > { %v3043_v37 = vpack.c.bf16 %v533_v50, %v472_v27  ;;  %v4648_v28 = vunpack.i.h.bf16 %v3925_v29  ;;  %vm4662_vm0 = vcmask 80896  }
 0x12a   : > { %v3485_v11 = vpop.permute.xlu1 %3484  ;;  %v2008_v30 = vsel %vm2006_vm14, %v3476_v23, %v3477_v6  ;;  %v2007_v56 = vsel %vm2006_vm14, %v3481_v32, %v3476_v23  ;;  %v2009_v26 = vsel %vm2006_vm14, %v3477_v6, %v3482_v63 }
 0x12b   : > { %v525_v12 = vpop.permute.xlu0 %524  ;;  %2313 = vmatprep.subr.mxu0 %v2008_v30  ;;  %v3486_v3 = vunpack.i.l.bf16 %v3485_v11 }
 0x12c   : > { %2314 = vmatpush1.msra.mxu0 %v2007_v56  ;;  %v534_v31 = vsel %vm526_vm1, %v3472_v15, %v525_v12  ;;  %v3487_v15 = vunpack.i.h.bf16 %v3485_v11  ;;  %vm4663_vm1 = vmmov %vm4662_vm0 }
 0x12d   : > { %2990 = vmatprep.subr.bf16.mxu0 %v2989_v48  ;;  %2326 = vmatmul.mubr.f32.vlgmr.msra.gmra.mrb[0].mxu0 %v3958_v58  ;;  %v3041_v47 = vpack.c.bf16 %v534_v31, %v473_v55  ;;  %v593_v56 = vsel %vm587_vm2, %v4648_v28, %v3486_v3 }
 0x12e   : > { %2992 = vmatpush1.bf16.msra.mxu0 %v4647_v22  ;;  %v4363_v32 = vpop.permute.xlu1 %1996  ;;  %2877 = vmatprep.mubr.msk.f32.mxu0 %vm2258_vm6, %v3964_v61  ;;  %v594_v29 = vsel %vm587_vm2, %v3486_v3, %v3487_v15 }
 0x12f   : > { %v3490_v23 = vpop.permute.xlu0 %3489  ;;  %v2010_v58 = vsel %vm2006_vm14, %v3482_v63, %v4363_v32 }
 0x130   : > { %v3492_v49 = vunpack.i.h.bf16 %v3490_v23  ;;  %v3491_v7 = vunpack.i.l.bf16 %v3490_v23  ;;  %2384 = vmatprep.subr.mxu1 %v2010_v58 }
 0x131   : > { %2385 = vmatpush1.msra.mxu1 %v2009_v26 }
 0x132   : > { %v647_v30 = vpop.permute.xlu1 %646  ;;  %3042 = vmatprep.subr.bf16.mxu1 %v3041_v47  ;;  %2397 = vmatmul.mubr.f32.vlgmr.msra.gmra.mrb[0].mxu1 %v4376_v8  ;;  %v654_v6 = vsel %vm648_vm3, %v4649_v33, %v3491_v7  ;;  %v655_v11 = vsel %vm648_vm3, %v3491_v7, %v3492_v49 }
 0x133   : > { %v656_v2 = vsel %vm648_vm3, %v3492_v49, %v647_v30  ;;  %v586_v46 = vpop.permute.xlu0 %585  ;;  %3044 = vmatpush1.bf16.msra.mxu1 %v3043_v37  ;;  %v2993_v12 = vpack.c.bf16 %v654_v6, %v593_v56  ;;  %2878 = vmatprep.mubr.msk.f32.mxu1 %vm2258_vm6, %v3964_v61  ;;  %v3047_v31 = vpack.c.bf16 %v655_v11, %v594_v29  ;;  %v4651_v61 = vunpack.i.h.bf16 %v3969_v0 }
 0x134   : > { %v595_v48 = vsel %vm587_vm2, %v3487_v15, %v586_v46  ;;  %v4652_v49 = vunpack.i.h.bf16 %v3978_v10  ;;  %v4653_v56 = vpack.c.bf16 %v3988_v21, %v3997_v34  ;;  %vm4664_vm2 = vmmov %vm4662_vm0  ;;  %vm4666_vm3 = vcmask 7168  }
 0x135   : > { %v3045_v63 = vpack.c.bf16 %v656_v2, %v595_v48  ;;  %2994 = vmatprep.subr.bf16.mxu0 %v2993_v12  ;;  %v4654_v12 = vunpack.i.h.bf16 %v4013_v59  ;;  %vm4671_vm6 = vcmask 973824  }
 0x136   : > { %2996 = vmatpush1.bf16.msra.mxu0 %v4650_v19  ;;  %v3500_v50 = vpop.permute.xlu1 %3499 }
 0x137   : > { %v3502_v22 = vunpack.i.h.bf16 %v3500_v50  ;;  %v3501_v27 = vunpack.i.l.bf16 %v3500_v50  ;;  %v3495_v55 = vpop.permute.xlu0 %3494  ;;  %3046 = vmatprep.subr.bf16.mxu1 %v3045_v63  ;;  %v4655_v63 = vunpack.i.h.bf16 %v4018_v1 }
 0x138   : > { %v3497_v23 = vunpack.i.h.bf16 %v3495_v55  ;;  %v3496_v58 = vunpack.i.l.bf16 %v3495_v55  ;;  %3048 = vmatpush1.bf16.msra.mxu1 %v3047_v31 }
 0x139   : > { %v776_v47 = vsel %vm770_vm5, %v4651_v61, %v3501_v27  ;;  %v777_v36 = vsel %vm770_vm5, %v3501_v27, %v3502_v22 }
 0x13a   : > { %v769_v3 = vpop.permute.xlu1 %768  ;;  %v715_v7 = vsel %vm709_vm4, %v4652_v49, %v3496_v58  ;;  %v716_v40 = vsel %vm709_vm4, %v3496_v58, %v3497_v23 }
 0x13b   : > { %v778_v26 = vsel %vm770_vm5, %v3502_v22, %v769_v3  ;;  %v708_v37 = vpop.permute.xlu0 %707  ;;  %v2997_v15 = vpack.c.bf16 %v776_v47, %v715_v7  ;;  %v3051_v0 = vpack.c.bf16 %v777_v36, %v716_v40  ;;  %v4657_v7 = vunpack.i.h.bf16 %v4053_v17  ;;  %vm4669_vm5 = vmmov %vm4666_vm3 }
 0x13c   : > { %v717_v30 = vsel %vm709_vm4, %v3497_v23, %v708_v37  ;;  %v4656_v23 = vpack.c.bf16 %v4028_v25, %v4037_v38  ;;  %vm4668_vm4 = vmmov %vm4666_vm3 }
 0x13d   : > { %v3049_v28 = vpack.c.bf16 %v778_v26, %v717_v30  ;;  %2998 = vmatprep.subr.bf16.mxu0 %v2997_v15  ;;  %v4658_v26 = vunpack.i.h.bf16 %v4058_v41 }
 0x13e   : > { %3000 = vmatpush1.bf16.msra.mxu0 %v4653_v56  ;;  %v3510_v10 = vpop.permute.xlu1 %3509 }
 0x13f   : > { %v3512_v33 = vunpack.i.h.bf16 %v3510_v10  ;;  %v3511_v6 = vunpack.i.l.bf16 %v3510_v10  ;;  %v3505_v11 = vpop.permute.xlu0 %3504  ;;  %3050 = vmatprep.subr.bf16.mxu1 %v3049_v28  ;;  %v4659_v10 = vpack.c.bf16 %v4068_v52, %v4078_v54 }
 0x140   : > { %v3507_v2 = vunpack.i.h.bf16 %v3505_v11  ;;  %v3506_v46 = vunpack.i.l.bf16 %v3505_v11  ;;  %3052 = vmatpush1.bf16.msra.mxu1 %v3051_v0 }
 0x141   : > { %v898_v48 = vsel %vm892_vm8, %v4654_v12, %v3511_v6  ;;  %v899_v21 = vsel %vm892_vm8, %v3511_v6, %v3512_v33  ;;  %v4660_v12 = vunpack.i.h.bf16 %v4096_v60 }
 0x142   : > { %v891_v29 = vpop.permute.xlu1 %890  ;;  %v837_v31 = vsel %vm831_vm7, %v4655_v63, %v3506_v46  ;;  %v838_v34 = vsel %vm831_vm7, %v3506_v46, %v3507_v2  ;;  %v4661_v63 = vunpack.i.h.bf16 %v4101_v39 }
 0x143   : > { %v900_v19 = vsel %vm892_vm8, %v3512_v33, %v891_v29  ;;  %v830_v50 = vpop.permute.xlu0 %829  ;;  %v3001_v22 = vpack.c.bf16 %v898_v48, %v837_v31  ;;  %v3055_v59 = vpack.c.bf16 %v899_v21, %v838_v34  ;;  %vm4674_vm8 = vmmov %vm4671_vm6 }
 0x144   : > { %v839_v27 = vsel %vm831_vm7, %v3507_v2, %v830_v50  ;;  %vm4673_vm7 = vcmask 1039360  }
 0x145   : > { %v3053_v55 = vpack.c.bf16 %v900_v19, %v839_v27  ;;  %3002 = vmatprep.subr.bf16.mxu0 %v3001_v22  ;;  %v4665_v27 = vpack.c.bf16 %v4112_v51, %v4121_v20 }
 0x146   : > { %3004 = vmatpush1.bf16.msra.mxu0 %v4656_v23  ;;  %v3520_v1 = vpop.permute.xlu1 %3519 }
 0x147   : > { %v3522_v58 = vunpack.i.h.bf16 %v3520_v1  ;;  %v3521_v61 = vunpack.i.l.bf16 %v3520_v1  ;;  %v3515_v47 = vpop.permute.xlu0 %3514  ;;  %3054 = vmatprep.subr.bf16.mxu1 %v3053_v55 }
 0x148   : > { %v3517_v3 = vunpack.i.h.bf16 %v3515_v47  ;;  %v3516_v49 = vunpack.i.l.bf16 %v3515_v47  ;;  %3056 = vmatpush1.bf16.msra.mxu1 %v3055_v59 }
 0x149   : > { %v1020_v36 = vsel %vm1014_vm10, %v4657_v7, %v3521_v61  ;;  %v1021_v25 = vsel %vm1014_vm10, %v3521_v61, %v3522_v58  ;;  %v4667_v61 = vunpack.i.h.bf16 %v4138_v53  ;;  %v4670_v53 = vunpack.i.h.bf16 %v4192_v45 }
 0x14a   : > { %v1013_v40 = vpop.permute.xlu1 %1012  ;;  %v959_v37 = vsel %vm953_vm9, %v4658_v26, %v3516_v49  ;;  %v960_v38 = vsel %vm953_vm9, %v3516_v49, %v3517_v3 }
 0x14b   : > { %v1022_v15 = vsel %vm1014_vm10, %v3522_v58, %v1013_v40  ;;  %v952_v30 = vpop.permute.xlu0 %951  ;;  %v3005_v28 = vpack.c.bf16 %v1020_v36, %v959_v37  ;;  %v3059_v17 = vpack.c.bf16 %v1021_v25, %v960_v38  ;;  %v3015_v40 = vpack.c.bf16 %v3739_v4, %v4158_v42  ;;  %vm4676_vm10 = vmmov %vm4671_vm6 }
 0x14c   : > { %v961_v0 = vsel %vm953_vm9, %v3517_v3, %v952_v30  ;;  %vm4675_vm9 = vmmov %vm4673_vm7 }
 0x14d   : > { %v3057_v56 = vpack.c.bf16 %v1022_v15, %v961_v0  ;;  %3006 = vmatprep.subr.bf16.mxu0 %v3005_v28  ;;  %v4672_v15 = vunpack.i.h.bf16 %v4168_v35 }
 0x14e   : > { %3008 = vmatpush1.bf16.msra.mxu0 %v4659_v10  ;;  %v3530_v41 = vpop.permute.xlu1 %3529 }
 0x14f   : > { %v3532_v33 = vunpack.i.h.bf16 %v3530_v41  ;;  %v3531_v6 = vunpack.i.l.bf16 %v3530_v41  ;;  %v3525_v11 = vpop.permute.xlu0 %3524  ;;  %3058 = vmatprep.subr.bf16.mxu1 %v3057_v56 }
 0x150   : > { %v3527_v2 = vunpack.i.h.bf16 %v3525_v11  ;;  %v3526_v46 = vunpack.i.l.bf16 %v3525_v11  ;;  %3060 = vmatpush1.bf16.msra.mxu1 %v3059_v17  ;;  %v4678_v17 = vpack.c.bf16 %v4207_v18, %v4184_v44 }
 0x151   : > { %v1142_v48 = vsel %vm1136_vm12, %v4660_v12, %v3531_v6  ;;  %v1143_v52 = vsel %vm1136_vm12, %v3531_v6, %v3532_v33 }
 0x152   : > { %v1135_v29 = vpop.permute.xlu1 %1134  ;;  %v1081_v31 = vsel %vm4662_vm0, %v4661_v63, %v3526_v46  ;;  %v1082_v54 = vsel %vm4663_vm1, %v3526_v46, %v3527_v2  ;;  %vm4680_vm0 = vcmask 957440   ;;  %vm4682_vm1 = vcmask 965632  }
 0x153   : > { %v1144_v21 = vsel %vm1136_vm12, %v3532_v33, %v1135_v29  ;;  %v1074_v34 = vpop.permute.xlu0 %1073  ;;  %v3009_v19 = vpack.c.bf16 %v1142_v48, %v1081_v31  ;;  %v3063_v60 = vpack.c.bf16 %v1143_v52, %v1082_v54  ;;  %vm4677_vm12 = vmmov %vm4673_vm7  ;;  %v4681_v48 = vunpack.i.h.bf16 %v4217_v57 }
 0x154   : > { %v1083_v50 = vsel %vm4664_vm2, %v3527_v2, %v1074_v34  ;;  %v4679_v2 = vunpack.i.h.bf16 %v4232_v43  ;;  %vm4683_vm2 = vmmov %vm4680_vm0  ;;  %v4687_v34 = vpack.c.bf16 %v4245_v24, %v4227_v14 }
 0x155   : > { %v3061_v22 = vpack.c.bf16 %v1144_v21, %v1083_v50  ;;  %3010 = vmatprep.subr.bf16.mxu0 %v3009_v19 }
 0x156   : > { %3012 = vmatpush1.bf16.msra.mxu0 %v4665_v27  ;;  %v1196_v39 = vpop.permute.xlu1 %1195 }
 0x157   : > { %v3535_v55 = vpop.permute.xlu0 %3534  ;;  %3062 = vmatprep.subr.bf16.mxu1 %v3061_v22 }
 0x158   : > { %v3537_v59 = vunpack.i.h.bf16 %v3535_v55  ;;  %v3536_v23 = vunpack.i.l.bf16 %v3535_v55  ;;  %3064 = vmatpush1.bf16.msra.mxu1 %v3063_v60 }
 0x15a   : > { %v1204_v1 = vsel %vm4666_vm3, %v3536_v23, %v3537_v59  ;;  %v3545_v58 = vpop.permute.xlu1 %3544  ;;  %v1203_v47 = vsel %vm4668_vm4, %v4667_v61, %v3536_v23  ;;  %v1205_v3 = vsel %vm4669_vm5, %v3537_v59, %v1196_v39  ;;  %vm4684_vm3 = vmmov %vm4682_vm1  ;;  %v4688_v39 = vld [vmem:[#allocation5_spill] sm:$0xff]  ;;  %v4691_v23 = vld [vmem:[#allocation4_spill] sm:$0xff] }
 0x15b   : > { %v3067_v49 = vpack.c.bf16 %v3747_v9, %v1204_v1  ;;  %v3547_v7 = vunpack.i.h.bf16 %v3545_v58  ;;  %v3546_v51 = vunpack.i.l.bf16 %v3545_v58  ;;  %v3540_v20 = vpop.permute.xlu0 %3539  ;;  %v3013_v36 = vpack.c.bf16 %v3741_v5, %v1203_v47  ;;  %vm4685_vm4 = vmmov %vm4680_vm0 }
 0x15c   : > { %v3542_v26 = vunpack.i.h.bf16 %v3540_v20  ;;  %v3541_v37 = vunpack.i.l.bf16 %v3540_v20  ;;  %v3065_v25 = vpack.c.bf16 %v3763_v13, %v1205_v3  ;;  %vm4686_vm5 = vmmov %vm4682_vm1 }
 0x15d   : > { %3014 = vmatprep.subr.bf16.mxu0 %v3013_v36  ;;  %v1341_v38 = vsel %vm4671_vm6, %v4670_v53, %v3546_v51  ;;  %v1342_v5 = vsel %vm4674_vm8, %v3546_v51, %v3547_v7  ;;  %vm4689_vm6 = vcmask 310272   ;;  %vm4692_vm8 = vcmask 318464  }
 0x15e   : > { %3066 = vmatprep.subr.bf16.mxu1 %v3065_v25  ;;  %3016 = vmatpush1.bf16.msra.mxu0 %v3015_v40  ;;  %v1334_v9 = vpop.permute.xlu1 %1333  ;;  %v1280_v30 = vsel %vm4673_vm7, %v4672_v15, %v3541_v37  ;;  %v1281_v4 = vsel %vm4675_vm9, %v3541_v37, %v3542_v26  ;;  %vm4690_vm7 = vmmov %vm4689_vm6 }
 0x15f   : > { %3068 = vmatpush1.bf16.msra.mxu1 %v3067_v49  ;;  %v1343_v42 = vsel %vm4676_vm10, %v3547_v7, %v1334_v9  ;;  %v1273_v13 = vpop.permute.xlu0 %1272  ;;  %v3017_v28 = vpack.c.bf16 %v1341_v38, %v1280_v30  ;;  %v3071_v56 = vpack.c.bf16 %v1342_v5, %v1281_v4  ;;  %vm4693_vm9 = vmmov %vm4692_vm8  ;;  %v4698_v4 = vld [vmem:[#allocation7_spill] sm:$0xff] }
 0x160   : > { %v1282_v45 = vsel %vm4677_vm12, %v3542_v26, %v1273_v13  ;;  %vm4694_vm10 = vmmov %vm4689_vm6 }
 0x161   : > { %v3069_v0 = vpack.c.bf16 %v1343_v42, %v1282_v45  ;;  %3018 = vmatprep.subr.bf16.mxu0 %v3017_v28  ;;  %vm4695_vm12 = vmmov %vm4689_vm6  ;;  %v4701_v28 = vld [vmem:[#allocation6_spill] sm:$0xff] }
 0x162   : > { %3020 = vmatpush1.bf16.msra.mxu0 %v4678_v17  ;;  %v3555_v35 = vpop.permute.xlu1 %3554 }
 0x163   : > { %v3557_v10 = vunpack.i.h.bf16 %v3555_v35  ;;  %v3556_v41 = vunpack.i.l.bf16 %v3555_v35  ;;  %v3550_v33 = vpop.permute.xlu0 %3549  ;;  %3070 = vmatprep.subr.bf16.mxu1 %v3069_v0 }
 0x164   : > { %v3552_v6 = vunpack.i.h.bf16 %v3550_v33  ;;  %v3551_v11 = vunpack.i.l.bf16 %v3550_v33  ;;  %3072 = vmatpush1.bf16.msra.mxu1 %v3071_v56 }
 0x165   : > { %v1463_v46 = vsel %vm4680_vm0, %v4679_v2, %v3556_v41  ;;  %v1464_v44 = vsel %vm4683_vm2, %v3556_v41, %v3557_v10  ;;  %vm4696_vm0 = vmmov %vm4692_vm8  ;;  %vm4699_vm2 = vcmask 236544  }
 0x166   : > { %v1456_v12 = vpop.permute.xlu1 %1455  ;;  %v1402_v29 = vsel %vm4682_vm1, %v4681_v48, %v3551_v11  ;;  %v1403_v18 = vsel %vm4684_vm3, %v3551_v11, %v3552_v6  ;;  %vm4697_vm1 = vmmov %vm4696_vm0 }
 0x167   : > { %v1465_v63 = vsel %vm4685_vm4, %v3557_v10, %v1456_v12  ;;  %v1395_v31 = vpop.permute.xlu0 %1394  ;;  %v3021_v52 = vpack.c.bf16 %v1463_v46, %v1402_v29  ;;  %v3075_v43 = vpack.c.bf16 %v1464_v44, %v1403_v18  ;;  %vm4700_vm3 = vmmov %vm4699_vm2  ;;  %vm4702_vm4 = vcmask 302080  }
 0x168   : > { %v1404_v54 = vsel %vm4686_vm5, %v3552_v6, %v1395_v31  ;;  %vm4703_vm5 = vmmov %vm4702_vm4 }
 0x169   : > { %v3073_v21 = vpack.c.bf16 %v1465_v63, %v1404_v54  ;;  %3022 = vmatprep.subr.bf16.mxu0 %v3021_v52 }
 0x16a   : > { %3024 = vmatpush1.bf16.msra.mxu0 %v4687_v34  ;;  %v3565_v57 = vpop.permute.xlu1 %3564 }
 0x16b   : > { %v3567_v19 = vunpack.i.h.bf16 %v3565_v57  ;;  %v3566_v50 = vunpack.i.l.bf16 %v3565_v57  ;;  %v3560_v22 = vpop.permute.xlu0 %3559  ;;  %3074 = vmatprep.subr.bf16.mxu1 %v3073_v21 }
 0x16c   : > { %v3562_v60 = vunpack.i.h.bf16 %v3560_v22  ;;  %v3561_v27 = vunpack.i.l.bf16 %v3560_v22  ;;  %3076 = vmatpush1.bf16.msra.mxu1 %v3075_v43  ;;  %v4708_v43 = vld [vmem:[#allocation9_spill] sm:$0xff] }
 0x16d   : > { %v1584_v55 = vsel %vm4689_vm6, %v4688_v39, %v3566_v50  ;;  %v1585_v59 = vsel %vm4690_vm7, %v3566_v50, %v3567_v19  ;;  %vm4704_vm6 = vmmov %vm4699_vm2 }
 0x16e   : > { %v1523_v1 = vsel %vm4692_vm8, %v4691_v23, %v3561_v27  ;;  %v3575_v58 = vpop.permute.xlu1 %3574  ;;  %v1524_v14 = vsel %vm4693_vm9, %v3561_v27, %v3562_v60  ;;  %vm4705_vm7 = vmmov %vm4699_vm2 }
 0x16f   : > { %v3027_v24 = vpack.c.bf16 %v1584_v55, %v1523_v1  ;;  %v3577_v61 = vunpack.i.h.bf16 %v3575_v58  ;;  %v3576_v47 = vunpack.i.l.bf16 %v3575_v58  ;;  %v3570_v3 = vpop.permute.xlu0 %3569  ;;  %v3025_v49 = vpack.c.bf16 %v1585_v59, %v1524_v14  ;;  %vm4706_vm8 = vmmov %vm4702_vm4 }
 0x170   : > { %v3572_v7 = vunpack.i.h.bf16 %v3570_v3  ;;  %v3571_v51 = vunpack.i.l.bf16 %v3570_v3  ;;  %vm4707_vm9 = vmmov %vm4702_vm4 }
 0x171   : > { %v1586_v20 = vsel %vm4694_vm10, %v3567_v19, %v3576_v47  ;;  %3026 = vmatprep.subr.bf16.mxu0 %v3025_v49  ;;  %v1587_v36 = vsel %vm4695_vm12, %v3576_v47, %v3577_v61  ;;  %v4709_v19 = vld [vmem:[#allocation8_spill] sm:$0xff]  ;;  %vm4710_vm10 = vcmask 228352  }
 0x172   : > { %v1525_v40 = vsel %vm4696_vm0, %v3562_v60, %v3571_v51  ;;  %3028 = vmatpush1.bf16.msra.mxu0 %v3027_v24  ;;  %v3585_v26 = vpop.permute.xlu1 %3584  ;;  %v1526_v37 = vsel %vm4697_vm1, %v3571_v51, %v3572_v7  ;;  %vm4711_vm12 = vmmov %vm4710_vm10 }
 0x173   : > { %v3079_v25 = vpack.c.bf16 %v1586_v20, %v1525_v40  ;;  %v3587_v53 = vunpack.i.h.bf16 %v3585_v26  ;;  %v3586_v38 = vunpack.i.l.bf16 %v3585_v26  ;;  %v3580_v9 = vpop.permute.xlu0 %3579  ;;  %v3077_v15 = vpack.c.bf16 %v1587_v36, %v1526_v37  ;;  %vm4712_vm0 = vmmov %vm4710_vm10 }
 0x174   : > { %v3582_v30 = vunpack.i.h.bf16 %v3580_v9  ;;  %v3581_v5 = vunpack.i.l.bf16 %v3580_v9  ;;  %vm4713_vm1 = vmmov %vm4712_vm0 }
 0x175   : > { %v1706_v42 = vsel %vm4699_vm2, %v4698_v4, %v3586_v38  ;;  %3078 = vmatprep.subr.bf16.mxu1 %v3077_v15  ;;  %v1707_v13 = vsel %vm4700_vm3, %v3586_v38, %v3587_v53 }
 0x176   : > { %v1645_v45 = vsel %vm4702_vm4, %v4701_v28, %v3581_v5  ;;  %3080 = vmatpush1.bf16.msra.mxu1 %v3079_v25  ;;  %v3595_v0 = vpop.permute.xlu1 %3594  ;;  %v1646_v56 = vsel %vm4703_vm5, %v3581_v5, %v3582_v30 }
 0x177   : > { %v3031_v17 = vpack.c.bf16 %v1706_v42, %v1645_v45  ;;  %v3597_v35 = vunpack.i.h.bf16 %v3595_v0  ;;  %v3596_v10 = vunpack.i.l.bf16 %v3595_v0  ;;  %v3590_v41 = vpop.permute.xlu0 %3589  ;;  %v3029_v33 = vpack.c.bf16 %v1707_v13, %v1646_v56 }
 0x178   : > { %v3592_v6 = vunpack.i.h.bf16 %v3590_v41  ;;  %v3591_v11 = vunpack.i.l.bf16 %v3590_v41 }
 0x179   : > { %v1708_v2 = vsel %vm4704_vm6, %v3587_v53, %v3596_v10  ;;  %3030 = vmatprep.subr.bf16.mxu0 %v3029_v33  ;;  %v1709_v46 = vsel %vm4705_vm7, %v3596_v10, %v3597_v35 }
 0x17a   : > { %v1647_v12 = vsel %vm4706_vm8, %v3582_v30, %v3591_v11  ;;  %3032 = vmatpush1.bf16.msra.mxu0 %v3031_v17  ;;  %v3605_v48 = vpop.permute.xlu1 %3604  ;;  %v1648_v29 = vsel %vm4707_vm9, %v3591_v11, %v3592_v6 }
 0x17b   : > { %v3083_v44 = vpack.c.bf16 %v1708_v2, %v1647_v12  ;;  %v3607_v18 = vunpack.i.h.bf16 %v3605_v48  ;;  %v3606_v63 = vunpack.i.l.bf16 %v3605_v48  ;;  %v3600_v31 = vpop.permute.xlu0 %3599  ;;  %v3081_v52 = vpack.c.bf16 %v1709_v46, %v1648_v29 }
 0x17c   : > { %v3602_v54 = vunpack.i.h.bf16 %v3600_v31  ;;  %v3601_v21 = vunpack.i.l.bf16 %v3600_v31  ;;  %v2550_v29 = vlaneseq }
 0x17d   : > { %v1828_v34 = vsel %vm1823_vm15, %v4708_v43, %v3606_v63  ;;  %3082 = vmatprep.subr.bf16.mxu1 %v3081_v52  ;;  %v1829_v57 = vsel %vm1823_vm15, %v3606_v63, %v3607_v18 }
 0x17e   : > { %v1767_v50 = vsel %vm4710_vm10, %v4709_v19, %v3601_v21  ;;  %3084 = vmatpush1.bf16.msra.mxu1 %v3083_v44  ;;  %v3615_v22 = vpop.permute.xlu1 %3614  ;;  %v1768_v60 = vsel %vm4711_vm12, %v3601_v21, %v3602_v54  ;;  %v2551_v44 = vshrl.u32 %v2550_v29, 7 }
 0x17f   : > { %v3035_v27 = vpack.c.bf16 %v1828_v34, %v1767_v50  ;;  %v3617_v39 = vunpack.i.h.bf16 %v3615_v22  ;;  %v3616_v55 = vunpack.i.l.bf16 %v3615_v22  ;;  %v3610_v59 = vpop.permute.xlu0 %3609  ;;  %v3033_v23 = vpack.c.bf16 %v1829_v57, %v1768_v60 }
 0x180   : > { %v3612_v1 = vunpack.i.h.bf16 %v3610_v59  ;;  %v3611_v58 = vunpack.i.l.bf16 %v3610_v59  ;;  %v4533_v31 = vsub.s32 0, %v2551_v44  ;;  %v2564_v43 = vsub.s32 6, %v2551_v44 }
 0x181   : > { %v1830_v14 = vsel %vm1823_vm15, %v3607_v18, %v3616_v55  ;;  %3034 = vmatprep.subr.bf16.mxu0 %v3033_v23  ;;  %v1831_v24 = vsel %vm1823_vm15, %v3616_v55, %v3617_v39  ;;  %v2545_v18 = vld [vmem:[%s328_s7] sm:$0xff]  ;;  %v3683_v34 = vmov 1966171168  }
 0x182   : > { %v1769_v61 = vsel %vm4712_vm0, %v3602_v54, %v3611_v58  ;;  %3036 = vmatpush1.bf16.msra.mxu0 %v3035_v27  ;;  %v3625_v47 = vpop.permute.xlu1 %3624  ;;  %v1770_v3 = vsel %vm4713_vm1, %v3611_v58, %v3612_v1  ;;  %v2546_v63 = vunpack.c.l.bf16 %v2545_v18  ;;  %v2560_v54 = vsub.s32 4, %v2551_v44 }
 0x183   : > { %v3087_v49 = vpack.c.bf16 %v1830_v14, %v1769_v61  ;;  %v3627_v7 = vunpack.i.h.bf16 %v3625_v47  ;;  %v3626_v51 = vunpack.i.l.bf16 %v3625_v47  ;;  %v3620_v20 = vpop.permute.xlu0 %3619  ;;  %v3085_v36 = vpack.c.bf16 %v1831_v24, %v1770_v3 }
 0x184   : > { %v3622_v40 = vunpack.i.h.bf16 %v3620_v20  ;;  %v3621_v26 = vunpack.i.l.bf16 %v3620_v20  ;;  %v2553_v52 = vrot.slane %v2546_v63, %v4533_v31  ;;  %v2651_v57 = vunpack.c.l.s4 %v3683_v34 }
 0x185   : > { %v1950_v37 = vsel %vm1945_vm11, %v4339_v16, %v3626_v51  ;;  %3086 = vmatprep.subr.bf16.mxu1 %v3085_v36  ;;  %v1951_v25 = vsel %vm1945_vm11, %v3626_v51, %v3627_v7  ;;  %v2561_v19 = vrot.slane %v2546_v63, %v2560_v54  ;;  %v2565_v22 = vrot.slane %v2546_v63, %v2564_v43 }
 0x186   : > { %v1889_v53 = vsel %vm1884_vm13, %v4333_v62, %v3621_v26  ;;  %3088 = vmatpush1.bf16.msra.mxu1 %v3087_v49  ;;  %v3635_v38 = vpop.permute.xlu1 %3634  ;;  %v1890_v9 = vsel %vm1884_vm13, %v3621_v26, %v3622_v40  ;;  %v2652_v27 = vunpack.c.0.s8 %v2651_v57 }
 0x187   : > { %v3039_v15 = vpack.c.bf16 %v1950_v37, %v1889_v53  ;;  %v3637_v30 = vunpack.i.h.bf16 %v3635_v38  ;;  %v3636_v5 = vunpack.i.l.bf16 %v3635_v38  ;;  %v3630_v4 = vpop.permute.xlu0 %3629  ;;  %v3037_v42 = vpack.c.bf16 %v1951_v25, %v1890_v9 }
 0x188   : > { %v3632_v13 = vunpack.i.h.bf16 %v3630_v4  ;;  %v3631_v28 = vunpack.i.l.bf16 %v3630_v4  ;;  %v2601_v59 = vrot.slane %v2561_v19, %v4533_v31  ;;  %v2605_v14 = vrot.slane %v2565_v22, %v4533_v31 }
 0x189   : > { %v1952_v45 = vsel %vm1945_vm11, %v3627_v7, %v3636_v5  ;;  %3038 = vmatprep.subr.bf16.mxu0 %v3037_v42  ;;  %v1953_v16 = vsel %vm1945_vm11, %v3636_v5, %v3637_v30  ;;  %vm2697_vm11 = vcmask 1041408   ;;  %v4541_v61 = vsub.s32 %v2652_v27, %v2551_v44 }
 0x18a   : > { %v1891_v0 = vsel %vm1884_vm13, %v3622_v40, %v3631_v28  ;;  %3040 = vmatpush1.bf16.msra.mxu0 %v3039_v15  ;;  %v3645_v62 = vpop.permute.xlu1 %3644  ;;  %v1892_v56 = vsel %vm1884_vm13, %v3631_v28, %v3632_v13  ;;  %vm2741_vm13 = vcmask 9216  }
 0x18b   : > { %v3091_v17 = vpack.c.bf16 %v1952_v45, %v1891_v0  ;;  %v3647_v35 = vunpack.i.h.bf16 %v3645_v62  ;;  %v3646_v10 = vunpack.i.l.bf16 %v3645_v62  ;;  %v3640_v41 = vpop.permute.xlu0 %3639  ;;  %v3089_v33 = vpack.c.bf16 %v1953_v16, %v1892_v56 }
 0x18c   : > { %v3642_v6 = vunpack.i.h.bf16 %v3640_v41  ;;  %v3641_v11 = vunpack.i.l.bf16 %v3640_v41  ;;  %v2547_v62 = vunpack.c.h.bf16 %v2545_v18 }
 0x18d   : > { %3090 = vmatprep.subr.bf16.mxu1 %v3089_v33  ;;  %v2014_v2 = vsel %vm2006_vm14, %v3646_v10, %v3647_v35 }
 0x18e   : > { %3092 = vmatpush1.bf16.msra.mxu1 %v3091_v17  ;;  %v2012_v46 = vsel %vm2006_vm14, %v3641_v11, %v3642_v6  ;;  %v2011_v12 = vsel %vm2006_vm14, %v4363_v32, %v3641_v11  ;;  %v2013_v48 = vsel %vm2006_vm14, %v3642_v6, %v3646_v10  ;;  %v2556_v32 = vsub.s32 2, %v2551_v44 }
 0x18f   : > { %2455 = vmatprep.subr.mxu0 %v2012_v46  ;;  %2526 = vmatprep.subr.mxu1 %v2014_v2  ;;  %v2569_v56 = vrot.slane %v2547_v62, %v4533_v31  ;;  %v2577_v35 = vrot.slane %v2547_v62, %v2560_v54  ;;  %v2581_v41 = vrot.slane %v2547_v62, %v2564_v43  ;;  %vm4714_vm14 = vcmask 7168  }
 0x190   : > { %2456 = vmatpush1.msra.mxu0 %v2011_v12  ;;  %v2557_v21 = vrot.slane %v2546_v63, %v2556_v32  ;;  %v2573_v17 = vrot.slane %v2547_v62, %v2556_v32 }
 0x191   : > { %2468 = vmatmul.mubr.f32.vlgmr.msra.gmra.mrb[2].mxu0 %v4376_v8  ;;  %v2609_v10 = vrot.slane %v2569_v56, %v4533_v31  ;;  %v2617_v6 = vrot.slane %v2577_v35, %v4533_v31  ;;  %v2621_v12 = vrot.slane %v2581_v41, %v4533_v31 }
 0x192   : > { %2527 = vmatpush1.msra.mxu1 %v2013_v48  ;;  %v2597_v50 = vrot.slane %v2557_v21, %v4533_v31  ;;  %v2613_v33 = vrot.slane %v2573_v17, %v4533_v31 }
 0x193   : > { %2539 = vmatmul.mubr.f32.vlgmr.msra.gmra.mrb[2].mxu1 %v4376_v8  ;;  %v2593_v8 = vrot.slane %v2553_v52, %v4533_v31 }
 0x200   : > { %v2327_v60 = vpop.f32.mrb[0].mxu0 }
 0x201   : > { %v2622_v39 = vmul.f32 %v2593_v8, %v2327_v60  ;;  %v2329_v55 = vpop.f32.mrb[1].mxu0 }
 0x202   : > { %v2623_v23 = vmul.f32 %v2597_v50, %v2329_v55 }
 0x203   : > { %v2698_v1 = vsel %vm2697_vm11, %v2622_v39, 0.0  ;;  %v2715_v58 = vmul.f32 %v2622_v39, %v2622_v39 }
 0x204   : > { %v2879_v24 = vpack.c.bf16 %v2623_v23, %v2622_v39  ;;  %v2699_v47 = vsel %vm2697_vm11, %v2623_v23, 0.0  ;;  %v2716_v3 = vmul.f32 %v2623_v23, %v2623_v23 }
 0x205   : > { %v2723_v49 = vsel %vm2697_vm11, %v2715_v58, 0.0  ;;  %v2398_v7 = vpop.f32.mrb[0].mxu1  ;;  %v2700_v51 = vadd.f32 %v2699_v47, %v2698_v1 }
 0x206   : > { %v2624_v20 = vmul.f32 %v2601_v59, %v2398_v7  ;;  %v2724_v36 = vsel %vm2697_vm11, %v2716_v3, 0.0  ;;  %v2400_v40 = vpop.f32.mrb[1].mxu1  ;;  %v2656_v38 = vrot.slane %v2879_v24, %v4541_v61 }
 0x207   : > { %v2725_v26 = vadd.f32 %v2724_v36, %v2723_v49  ;;  %v2625_v37 = vmul.f32 %v2605_v14, %v2400_v40 }
 0x208   : > { %v2701_v25 = vsel %vm2697_vm11, %v2624_v20, 0.0  ;;  %v2717_v53 = vmul.f32 %v2624_v20, %v2624_v20 }
 0x209   : > { %v2880_v9 = vpack.c.bf16 %v2625_v37, %v2624_v20  ;;  %v2702_v15 = vadd.f32 %v2701_v25, %v2700_v51  ;;  %v2703_v30 = vsel %vm2697_vm11, %v2625_v37, 0.0  ;;  %v2718_v5 = vmul.f32 %v2625_v37, %v2625_v37 }
 0x20a   : > { %v2726_v4 = vsel %vm2697_vm11, %v2717_v53, 0.0 }
 0x20b   : > { %v2663_v42 = vrot.slane %v2880_v9, %v4541_v61  ;;  %v2704_v13 = vadd.f32 %v2703_v30, %v2702_v15  ;;  %v2727_v28 = vadd.f32 %v2726_v4, %v2725_v26  ;;  %v2728_v45 = vsel %vm2697_vm11, %v2718_v5, 0.0 }
 0x20d   : > { %v2678_v16 = vcombine.low %v2656_v38, %v2663_v42  ;;  %v2729_v0 = vadd.f32 %v2728_v45, %v2727_v28 }
 0x20f   : > { %v2686_v7 = vrot.slane %v2678_v16, %v4541_v61 }
 0x264   : > { %v2469_v11 = vpop.f32.mrb[2].mxu0 }
 0x265   : > { %v2626_v2 = vmul.f32 %v2609_v10, %v2469_v11  ;;  %v2471_v46 = vpop.f32.mrb[3].mxu0 }
 0x266   : > { %v2627_v48 = vmul.f32 %v2613_v33, %v2471_v46  ;;  %v2540_v29 = vpop.f32.mrb[2].mxu1 }
 0x267   : > { %v2705_v44 = vsel %vm2697_vm11, %v2626_v2, 0.0  ;;  %v2719_v18 = vmul.f32 %v2626_v2, %v2626_v2  ;;  %v2628_v63 = vmul.f32 %v2617_v6, %v2540_v29  ;;  %v2542_v32 = vpop.f32.mrb[3].mxu1 }
 0x268   : > { %v2706_v52 = vadd.f32 %v2705_v44, %v2704_v13  ;;  %v2881_v54 = vpack.c.bf16 %v2627_v48, %v2626_v2  ;;  %v2707_v21 = vsel %vm2697_vm11, %v2627_v48, 0.0  ;;  %v2720_v43 = vmul.f32 %v2627_v48, %v2627_v48 }
 0x269   : > { %v2730_v34 = vsel %vm2697_vm11, %v2719_v18, 0.0  ;;  %v2709_v57 = vsel %vm2697_vm11, %v2628_v63, 0.0  ;;  %v2721_v8 = vmul.f32 %v2628_v63, %v2628_v63  ;;  %v2629_v19 = vmul.f32 %v2621_v12, %v2542_v32 }
 0x26a   : > { %v2731_v50 = vadd.f32 %v2730_v34, %v2729_v0  ;;  %v2708_v31 = vadd.f32 %v2707_v21, %v2706_v52  ;;  %v2732_v22 = vsel %vm2697_vm11, %v2720_v43, 0.0  ;;  %v2670_v23 = vrot.slane %v2881_v54, %v4541_v61 }
 0x26b   : > { %v2882_v60 = vpack.c.bf16 %v2629_v19, %v2628_v63  ;;  %v2722_v27 = vmul.f32 %v2629_v19, %v2629_v19  ;;  %v2734_v39 = vsel %vm2697_vm11, %v2721_v8, 0.0  ;;  %v2711_v58 = vsel %vm2697_vm11, %v2629_v19, 0.0 }
 0x26c   : > { %v2710_v55 = vadd.f32 %v2709_v57, %v2708_v31  ;;  %v2733_v59 = vadd.f32 %v2732_v22, %v2731_v50 }
 0x26d   : > { %v2677_v1 = vrot.slane %v2882_v60, %v4541_v61  ;;  %v2736_v3 = vsel %vm2697_vm11, %v2722_v27, 0.0 }
 0x26e   : > { %v2712_v14 = vadd.f32 %v2711_v58, %v2710_v55  ;;  %v2735_v24 = vadd.f32 %v2734_v39, %v2733_v59 }
 0x26f   : > { %v2679_v47 = vcombine.low %v2670_v23, %v2677_v1 }
 0x270   : > { %2713 = vadd.xlane.f32.xlu0 %v2712_v14  ;;  %v2737_v49 = vadd.f32 %v2736_v3, %v2735_v24 }
 0x271   : > { %v2693_v51 = vrot.slane %v2679_v47, %v4541_v61 }
 0x272   : > { %2738 = vadd.xlane.f32.xlu1 %v2737_v49 }
 0x273   : > { %v2694_v20 = vcombine.low %v2686_v7, %v2693_v51 }
 0x275   : > { %2696 = vst [vmem:[%s363_s10] sm:$0xff] %v2694_v20 }
 0x2fd   : > { %v2714_v36 = vpop.xlane.xlu0 %2713 }
 0x2ff   : > { %v2739_v40 = vpop.xlane.xlu1 %2738 }
 0x300   : > { %v2740_v26 = vsel %vm4714_vm14, %v2714_v36, %v2739_v40 }
 0x301   : > { %2742 = vst.msk [vmem:[%s368_s13] sm:$0x3] %vm2741_vm13, %v2740_v26 }
 0x302 PF: > { %s17_s21 = sadd.s32 1, %s3655_s21  }
 0x303   : > { %p14_p9 = scmp.ge.s32.totalorder %s17_s21, 4  }
 0x305   :  { %16 = sbr.rel (!%p14_p9) target bundleno = 1 (0x1), region = 91 }

</bundles_post_ra>
